<compile_context>
chip_gen: v5e
topology: v5e:2x2
jax: 0.10.0
libtpu: 0.0.40
codegen_flags: <defaults>
</compile_context>

<pallas_src>
import jax
import jax.numpy as jnp
from jax import lax
from jax.experimental import pallas as pl
from jax.experimental.pallas import tpu as pltpu


# ----------------------------------------------------------------------------- kernel
def full_gru_kernel(s_ref, wih_ref, whh_ref, gbias_ref, bhn_ref, wlin_ref,
                    obias_ref, out_ref, h_ref, gi_ref, hist_ref):
    """One (batch-block, time-block) tile of the GRU + linear readout.

    s_ref    : (t_tile, b_tile, D)  time-major input tile (compute dtype)
    wih_ref  : (D, 3H)  merged input->gates weights (compute dtype)
    whh_ref  : (H, 3H)  hidden->gates weights (compute dtype)
    gbias_ref: (1, 3H)  gi-side bias: bias_ih with the r/z parts of bias_hh folded in (f32)
    bhn_ref  : (1, H)   n-gate hidden bias (must stay inside the r*(.) term) (f32)
    wlin_ref : (1, H)   readout weight (f32)
    obias_ref: (1, 1)   lin_b + V_o (f32)
    out_ref  : (b_tile, t_tile)  output tile
    h_ref    : (b_tile, H)          persistent hidden state (f32 scratch)
    gi_ref   : (t_tile, b_tile, 3H) time-major input-gate preactivations (compute dtype)
    hist_ref : (t_tile, b_tile, H)  time-major hidden-state history (compute dtype)
    """
    t_tile, b_tile, D = s_ref.shape
    H = whh_ref.shape[0]
    cdt = whh_ref.dtype                       # MXU operand ("compute") dtype

    # Reset hidden state at the start of each batch block's time sweep.
    @pl.when(pl.program_id(1) == 0)
    def _():
        h_ref[...] = jnp.zeros_like(h_ref)

    # ---- Hoisted input projection: ONE flattened MXU matmul for the whole tile,
    # written contiguously into the time-major gi scratch (per-step access below
    # is a cheap leading-axis index). Bias added once for the whole tile.
    s_flat = s_ref[...].reshape(t_tile * b_tile, D)
    gi_flat = (jnp.dot(s_flat, wih_ref[...], preferred_element_type=jnp.float32)
               + gbias_ref[...])                                  # (t*b, 3H) f32
    gi_ref[...] = gi_flat.reshape(t_tile, b_tile, 3 * H).astype(gi_ref.dtype)

    whh = whh_ref[...]
    bhn = bhn_ref[...]                        # (1, H) f32

    # ---- Serial recurrence (readout hoisted out of the loop).
    def step(t, h):
        gi = gi_ref[t].astype(jnp.float32)                            # (b_tile, 3H)
        gh = jnp.dot(h.astype(cdt), whh,
                     preferred_element_type=jnp.float32)              # (b_tile, 3H)
        r = jax.nn.sigmoid(gi[:, 0 * H:1 * H] + gh[:, 0 * H:1 * H])
        z = jax.nn.sigmoid(gi[:, 1 * H:2 * H] + gh[:, 1 * H:2 * H])
        n = jnp.tanh(gi[:, 2 * H:3 * H] + r * (gh[:, 2 * H:3 * H] + bhn))
        h_new = (1.0 - z) * n + z * h                                 # (b_tile, H) f32
        hist_ref[t] = h_new.astype(hist_ref.dtype)                    # contiguous store
        return h_new

    h_final = lax.fori_loop(0, t_tile, step, h_ref[...],
                            unroll=min(int(t_tile), 8))
    h_ref[...] = h_final                      # carry h into the next time block

    # ---- Hoisted linear readout: VPU multiply + lane reduce over H, once per tile.
    w = wlin_ref[...].reshape(1, 1, H)                                # (1, 1, H) f32
    y_tb = (jnp.sum(hist_ref[...].astype(jnp.float32) * w, axis=-1)
            + obias_ref[...])                                         # (t_tile, b_tile)
    out_ref[...] = y_tb.T.astype(out_ref.dtype)                       # (b_tile, t_tile)


# ----------------------------------------------------------------------------- tiling
def _device_kind():
    try:
        return jax.devices()[0].device_kind.lower()
    except Exception:
        return ""


def _pick_b_tile(B, cap, prefer_split):
    """Large batch tile to fill the MXU rows of the per-step hh matmul."""
    if prefer_split and B >= 16:              # v7x: keep >=2 blocks for the 2 TCs
        cap = min(cap, max(8, B // 2))
    if B <= cap:
        return B                              # block == full dim -> always legal
    best = None
    for cand in range(8, cap + 1, 8):         # largest multiple-of-8 divisor <= cap
        if B % cand == 0:
            best = cand
    if best is not None:
        return best
    return max(8, (cap // 8) * 8)             # ragged trailing batch block (pad rows dropped)


def _pick_t_tile(T, b_tile, H, D, item, budget):
    """Balance t_tile against the gi/hist scratches and double-buffered tiles."""
    per_t = b_tile * (3 * H + H) * item       # gi + hist scratch per time step
    per_t += 2 * b_tile * D * item            # double-buffered input tile
    per_t += 2 * b_tile * 4                   # double-buffered f32 output tile
    max_t = max(8, int(budget // max(per_t, 1)))
    if T <= max_t:
        return T                              # whole sequence fits as one tile
    t = max(128, (max_t // 128) * 128)        # keep the output lane-dense (mult. of 128)
    for cand in range(t, 127, -128):
        if T % cand == 0:
            return cand
    return min(t, T)                          # ragged trailing T block (pad steps harmless)


def _estimate_vmem_bytes(b_tile, t_tile, D, H, item):
    gi = t_tile * b_tile * 3 * H * item
    hist = t_tile * b_tile * H * item
    h = b_tile * H * 4
    inp = 2 * t_tile * b_tile * D * item
    outp = 2 * b_tile * t_tile * 4
    w = 2 * ((D + H) * 3 * H * item + (3 * H + 2 * H + 1) * 4)
    return gi + hist + h + inp + outp + w


# ----------------------------------------------------------------------------- wrapper
def full_gru_forward(S_e, S_i, params, *, compute_dtype=jnp.bfloat16):
    """Matches Full_GRU.forward: returns (B, T) float32.

    compute_dtype: dtype of the MXU matmul operands (bf16 default for v5e/v6e/v7x
    MXU rate; accumulation, hidden-state carry and gate math stay float32).
    Use compute_dtype=jnp.float32 for bit-exact checks against the reference.
    """
    B, T, E = S_e.shape
    I = S_i.shape[-1]
    H = params["weight_hh"].shape[1]
    D = E + I
    cdt = jnp.dtype(compute_dtype)
    item = cdt.itemsize

    # Inputs: one concat + one transpose to time-major + one cast (wrapper-side,
    # cheap vs. the serial recurrence; enables a single flattened in-kernel matmul).
    S = jnp.concatenate([S_e.astype(jnp.float32), S_i.astype(jnp.float32)], axis=-1)
    S_tm = jnp.transpose(S, (1, 0, 2)).astype(cdt)                 # (T, B, D)

    # Weight prep (tiny, one-time).
    wih = jnp.asarray(params["weight_ih"]).T.astype(cdt)           # (D, 3H), gates r,z,n
    whh = jnp.asarray(params["weight_hh"]).T.astype(cdt)           # (H, 3H)
    bih = jnp.asarray(params["bias_ih"], jnp.float32)
    bhh = jnp.asarray(params["bias_hh"], jnp.float32)
    # Fold the r/z parts of bias_hh into the gi-side bias (added once per tile in the
    # hoisted phase); only the n-gate hidden bias must stay inside r*(.) per step.
    gbias = bih.at[:2 * H].add(bhh[:2 * H]).reshape(1, 3 * H)
    bhn = bhh[2 * H:].reshape(1, H)
    wlin = jnp.asarray(params["lin_w"], jnp.float32).reshape(1, H)
    obias = (jnp.asarray(params["lin_b"], jnp.float32).reshape(1, 1)
             + jnp.asarray(params["V_o"], jnp.float32).reshape(1, 1))

    # Per-generation tile caps / VMEM budgets (v7x has half the VMEM, 2 TCs).
    kind = _device_kind()
    if "v7" in kind:
        b_cap, vmem_cap, prefer_split = 128, 48 * 1024 * 1024, True
    elif "v6" in kind:
        b_cap, vmem_cap, prefer_split = 256, 96 * 1024 * 1024, False
    else:                                     # v5e / unknown
        b_cap, vmem_cap, prefer_split = 128, 96 * 1024 * 1024, False

    b_tile = _pick_b_tile(B, b_cap, prefer_split)
    t_tile = _pick_t_tile(T, b_tile, H, D, item, budget=vmem_cap // 2)
    grid = (pl.cdiv(B, b_tile), pl.cdiv(T, t_tile))

    est = _estimate_vmem_bytes(b_tile, t_tile, D, H, item)
    vmem_limit = int(min(vmem_cap, max(32 * 1024 * 1024, 2 * est)))

    # Ragged trailing tiles only occur at the END of each axis: padded time steps /
    # batch rows only update state that no valid output ever consumes, and their
    # outputs are dropped at writeback, so recurrence semantics stay correct.
    out = pl.pallas_call(
        full_gru_kernel,
        out_shape=jax.ShapeDtypeStruct((B, T), jnp.float32),
        grid_spec=pltpu.PrefetchScalarGridSpec(
            num_scalar_prefetch=0,
            grid=grid,
            in_specs=[
                pl.BlockSpec((t_tile, b_tile, D), lambda b, t: (t, b, 0)),
                pl.BlockSpec((D, 3 * H), lambda b, t: (0, 0)),
                pl.BlockSpec((H, 3 * H), lambda b, t: (0, 0)),
                pl.BlockSpec((1, 3 * H), lambda b, t: (0, 0)),
                pl.BlockSpec((1, H), lambda b, t: (0, 0)),
                pl.BlockSpec((1, H), lambda b, t: (0, 0)),
                pl.BlockSpec((1, 1), lambda b, t: (0, 0)),
            ],
            out_specs=pl.BlockSpec((b_tile, t_tile), lambda b, t: (b, t)),
            scratch_shapes=[
                pltpu.VMEM((b_tile, H), jnp.float32),        # persistent h (f32 carry)
                pltpu.VMEM((t_tile, b_tile, 3 * H), cdt),    # gi (time-major, compute dtype)
                pltpu.VMEM((t_tile, b_tile, H), cdt),        # h history (compute dtype)
            ],
        ),
        compiler_params=pltpu.CompilerParams(
            dimension_semantics=("parallel", "arbitrary"),
            vmem_limit_bytes=vmem_limit,
        ),
    )(S_tm, wih, whh, gbias, bhn, wlin, obias)
    return out                                               # (B, T)


# ----------------------------------------------------------------------------- reference
def ref_forward(S_e, S_i, params):
    """Pure-JAX reference (mirrors torch.nn.GRU + Linear + V_o)."""
    S = jnp.concatenate([S_e, S_i], axis=-1).astype(jnp.float32)
    wih, whh = params["weight_ih"], params["weight_hh"]
    bih, bhh = params["bias_ih"], params["bias_hh"]
    H = whh.shape[1]

    def cell(h, x):
        gi = x @ wih.T + bih
        gh = h @ whh.T + bhh
        r = jax.nn.sigmoid(gi[:, :H] + gh[:, :H])
        z = jax.nn.sigmoid(gi[:, H:2 * H] + gh[:, H:2 * H])
        n = jnp.tanh(gi[:, 2 * H:] + r * gh[:, 2 * H:])
        h_new = (1.0 - z) * n + z * h
        return h_new, h_new

    h0 = jnp.zeros((S.shape[0], H), jnp.float32)
    _, hs = lax.scan(cell, h0, jnp.swapaxes(S, 0, 1))        # (T, B, H)
    rnn_out = jnp.swapaxes(hs, 0, 1)                         # (B, T, H)
    lin = rnn_out @ params["lin_w"].T + params["lin_b"]      # (B, T, 1)
    return lin[..., 0] + params["V_o"]


def init_params(key, E_no, I_no, H_no):
    D = E_no + I_no
    k = 1.0 / jnp.sqrt(jnp.float32(H_no))
    ks = jax.random.split(key, 6)
    u = lambda kk, shape: jax.random.uniform(kk, shape, jnp.float32, -k, k)
    return {
        "weight_ih": u(ks[0], (3 * H_no, D)),    # (3H, E+I), gates ordered r, z, n
        "weight_hh": u(ks[1], (3 * H_no, H_no)),
        "bias_ih":   u(ks[2], (3 * H_no,)),
        "bias_hh":   u(ks[3], (3 * H_no,)),
        "lin_w":     u(ks[4], (1, H_no)),
        "lin_b":     u(ks[5], (1,)),
        "V_o":       jnp.zeros((1,), jnp.float32),
    }


# ----------------------------------------------------------------------------- demo
if __name__ == "__main__":
    E_no, I_no, H_no = 4, 4, 32
    B, T = 2, 8

    root = jax.random.PRNGKey(0)
    k_par, k_se, k_si = jax.random.split(root, 3)
    params = init_params(k_par, E_no, I_no, H_no)
    S_e = jax.random.normal(k_se, (B, T, E_no), jnp.float32)
    S_i = jax.random.normal(k_si, (B, T, I_no), jnp.float32)

    ref = jax.block_until_ready(ref_forward(S_e, S_i, params))

    # f32 MXU operands: tight check against the pure-JAX reference.
    out_f32 = jax.block_until_ready(
        full_gru_forward(S_e, S_i, params, compute_dtype=jnp.float32))
    assert out_f32.shape == (B, T)
    assert jnp.allclose(out_f32, ref, atol=1e-5, rtol=1e-5), (out_f32, ref)

    # Default (bf16 MXU operands) fast path: f32 accumulation / gate math / h carry,
    # so the result stays close to the f32 reference at these shapes.
    # TODO(synk): validate bf16 deviation at production T/H (error feeds back through h).
    out_bf16 = jax.block_until_ready(full_gru_forward(S_e, S_i, params))
    assert out_bf16.shape == (B, T)
    assert bool(jnp.all(jnp.isfinite(out_bf16)))
    assert float(jnp.max(jnp.abs(out_bf16 - ref))) < 1e-1

    print("KERNEL_OK")
</pallas_src>

<mosaic_0001>
module attributes {stable_mosaic.version = 11 : i64} {
  func.func @full_gru_kernel(%arg0: i32, %arg1: i32, %arg2: memref<8x2x8xf32, #tpu.memory_space<vmem>>, %arg3: memref<8x96xf32, #tpu.memory_space<vmem>>, %arg4: memref<32x96xf32, #tpu.memory_space<vmem>>, %arg5: memref<1x96xf32, #tpu.memory_space<vmem>>, %arg6: memref<1x32xf32, #tpu.memory_space<vmem>>, %arg7: memref<1x32xf32, #tpu.memory_space<vmem>>, %arg8: memref<1x1xf32, #tpu.memory_space<vmem>>, %arg9: memref<2x8xf32, #tpu.memory_space<vmem>>, %arg10: memref<2x32xf32, #tpu.memory_space<vmem>>, %arg11: memref<8x2x96xf32, #tpu.memory_space<vmem>>, %arg12: memref<8x2x32xf32, #tpu.memory_space<vmem>>) attributes {dimension_semantics = [#tpu.dimension_semantics<parallel>, #tpu.dimension_semantics<arbitrary>], iteration_bounds = array<i64: 1, 1>, scalar_prefetch = 0 : i64, scratch_operands = 3 : i64, tpu.core_type = #tpu.core_type<tc>, window_params = [{transform_indices = @transform_0, window_bounds = array<i64: 8, 2, 8>}, {pipeline_mode = #tpu.pipeline_mode<synchronous>, transform_indices = @transform_1, window_bounds = array<i64: 8, 96>}, {pipeline_mode = #tpu.pipeline_mode<synchronous>, transform_indices = @transform_2, window_bounds = array<i64: 32, 96>}, {pipeline_mode = #tpu.pipeline_mode<synchronous>, transform_indices = @transform_3, window_bounds = array<i64: 1, 96>}, {pipeline_mode = #tpu.pipeline_mode<synchronous>, transform_indices = @transform_4, window_bounds = array<i64: 1, 32>}, {pipeline_mode = #tpu.pipeline_mode<synchronous>, transform_indices = @transform_5, window_bounds = array<i64: 1, 32>}, {pipeline_mode = #tpu.pipeline_mode<synchronous>, transform_indices = @transform_6, window_bounds = array<i64: 1, 1>}, {transform_indices = @transform_7, window_bounds = array<i64: 2, 8>}]} {
    %c0_i32 = arith.constant 0 : i32
    %0 = arith.cmpi eq, %arg1, %c0_i32 : i32
    %1 = arith.extui %0 : i1 to i32
    %c0_i32_0 = arith.constant 0 : i32
    %2 = arith.cmpi ne, %1, %c0_i32_0 : i32
    scf.if %2 {
      %cst_93 = arith.constant 0.000000e+00 : f32
      %315 = vector.broadcast %cst_93 : f32 to vector<2x32xf32>
      %c0_94 = arith.constant 0 : index
      %c0_95 = arith.constant 0 : index
      %316 = vector.load %arg10[%c0_94, %c0_95] : memref<2x32xf32, #tpu.memory_space<vmem>>, vector<2x32xf32>
      tpu.vector_store %arg10[%c0_94, %c0_95], %315 {strides = array<i32>} : memref<2x32xf32, #tpu.memory_space<vmem>>, vector<2x32xf32>,
    } else {
    }
    %c0 = arith.constant 0 : index
    %c0_1 = arith.constant 0 : index
    %c0_2 = arith.constant 0 : index
    %3 = vector.load %arg2[%c0, %c0_1, %c0_2] : memref<8x2x8xf32, #tpu.memory_space<vmem>>, vector<8x2x8xf32>
    %4 = vector.shape_cast %3 : vector<8x2x8xf32> to vector<16x8xf32>
    %c0_3 = arith.constant 0 : index
    %c0_4 = arith.constant 0 : index
    %5 = vector.load %arg3[%c0_3, %c0_4] : memref<8x96xf32, #tpu.memory_space<vmem>>, vector<8x96xf32>
    %cst = arith.constant dense<0.000000e+00> : vector<16x96xf32>
    %6 = tpu.matmul %4, %5, %cst {dimension_numbers = #tpu.dot_dimension_numbers<[1], [0], [0], [1], [0, 0, 1, 1], [], []>} : vector<16x8xf32>, vector<8x96xf32>, vector<16x96xf32> -> vector<16x96xf32>
    %c0_5 = arith.constant 0 : index
    %c0_6 = arith.constant 0 : index
    %7 = vector.load %arg5[%c0_5, %c0_6] : memref<1x96xf32, #tpu.memory_space<vmem>>, vector<1x96xf32>
    %8 = vector.broadcast %7 : vector<1x96xf32> to vector<16x96xf32>
    %9 = arith.addf %6, %8 : vector<16x96xf32>
    %10 = vector.shape_cast %9 : vector<16x96xf32> to vector<8x2x96xf32>
    %c0_7 = arith.constant 0 : index
    %c0_8 = arith.constant 0 : index
    %c0_9 = arith.constant 0 : index
    %11 = vector.load %arg11[%c0_7, %c0_8, %c0_9] : memref<8x2x96xf32, #tpu.memory_space<vmem>>, vector<8x2x96xf32>
    tpu.vector_store %arg11[%c0_7, %c0_8, %c0_9], %10 {strides = array<i32>} : memref<8x2x96xf32, #tpu.memory_space<vmem>>, vector<8x2x96xf32>,
    %c0_10 = arith.constant 0 : index
    %c0_11 = arith.constant 0 : index
    %12 = vector.load %arg4[%c0_10, %c0_11] : memref<32x96xf32, #tpu.memory_space<vmem>>, vector<32x96xf32>
    %c0_12 = arith.constant 0 : index
    %c0_13 = arith.constant 0 : index
    %13 = vector.load %arg6[%c0_12, %c0_13] : memref<1x32xf32, #tpu.memory_space<vmem>>, vector<1x32xf32>
    %c0_14 = arith.constant 0 : index
    %c0_15 = arith.constant 0 : index
    %14 = vector.load %arg10[%c0_14, %c0_15] : memref<2x32xf32, #tpu.memory_space<vmem>>, vector<2x32xf32>
    %c0_i32_16 = arith.constant 0 : i32
    %15 = arith.index_cast %c0_i32_16 : i32 to index
    %c0_17 = arith.constant 0 : index
    %c0_18 = arith.constant 0 : index
    %16 = vector.load %arg11[%15, %c0_17, %c0_18] : memref<8x2x96xf32, #tpu.memory_space<vmem>>, vector<1x2x96xf32>
    %17 = vector.shape_cast %16 : vector<1x2x96xf32> to vector<2x96xf32>
    %cst_19 = arith.constant dense<0.000000e+00> : vector<2x96xf32>
    %18 = tpu.matmul %14, %12, %cst_19 {dimension_numbers = #tpu.dot_dimension_numbers<[1], [0], [0], [1], [0, 0, 1, 1], [], []>} : vector<2x32xf32>, vector<32x96xf32>, vector<2x96xf32> -> vector<2x96xf32>
    %19 = vector.extract_strided_slice %17 {offsets = [0, 0], sizes = [2, 32], strides = [1, 1]} : vector<2x96xf32> to vector<2x32xf32>
    %20 = vector.extract_strided_slice %18 {offsets = [0, 0], sizes = [2, 32], strides = [1, 1]} : vector<2x96xf32> to vector<2x32xf32>
    %21 = arith.addf %19, %20 : vector<2x32xf32>
    %22 = arith.negf %21 : vector<2x32xf32>
    %23 = math.exp %22 : vector<2x32xf32>
    %cst_20 = arith.constant 1.000000e+00 : f32
    %24 = vector.broadcast %cst_20 : f32 to vector<2x32xf32>
    %25 = arith.addf %24, %23 : vector<2x32xf32>
    %26 = arith.divf %24, %25 : vector<2x32xf32>
    %27 = vector.extract_strided_slice %17 {offsets = [0, 32], sizes = [2, 32], strides = [1, 1]} : vector<2x96xf32> to vector<2x32xf32>
    %28 = vector.extract_strided_slice %18 {offsets = [0, 32], sizes = [2, 32], strides = [1, 1]} : vector<2x96xf32> to vector<2x32xf32>
    %29 = arith.addf %27, %28 : vector<2x32xf32>
    %30 = arith.negf %29 : vector<2x32xf32>
    %31 = math.exp %30 : vector<2x32xf32>
    %cst_21 = arith.constant 1.000000e+00 : f32
    %32 = vector.broadcast %cst_21 : f32 to vector<2x32xf32>
    %33 = arith.addf %32, %31 : vector<2x32xf32>
    %34 = arith.divf %32, %33 : vector<2x32xf32>
    %35 = vector.extract_strided_slice %17 {offsets = [0, 64], sizes = [2, 32], strides = [1, 1]} : vector<2x96xf32> to vector<2x32xf32>
    %36 = vector.extract_strided_slice %18 {offsets = [0, 64], sizes = [2, 32], strides = [1, 1]} : vector<2x96xf32> to vector<2x32xf32>
    %37 = vector.broadcast %13 : vector<1x32xf32> to vector<2x32xf32>
    %38 = arith.addf %36, %37 : vector<2x32xf32>
    %39 = arith.mulf %26, %38 : vector<2x32xf32>
    %40 = arith.addf %35, %39 : vector<2x32xf32>
    %41 = math.tanh %40 : vector<2x32xf32>
    %cst_22 = arith.constant 1.000000e+00 : f32
    %42 = vector.broadcast %cst_22 : f32 to vector<2x32xf32>
    %43 = arith.subf %42, %34 : vector<2x32xf32>
    %44 = arith.mulf %43, %41 : vector<2x32xf32>
    %45 = arith.mulf %34, %14 : vector<2x32xf32>
    %46 = arith.addf %44, %45 : vector<2x32xf32>
    %47 = arith.index_cast %c0_i32_16 : i32 to index
    %c0_23 = arith.constant 0 : index
    %c0_24 = arith.constant 0 : index
    %48 = vector.load %arg12[%47, %c0_23, %c0_24] : memref<8x2x32xf32, #tpu.memory_space<vmem>>, vector<1x2x32xf32>
    %49 = vector.shape_cast %48 : vector<1x2x32xf32> to vector<2x32xf32>
    %50 = vector.shape_cast %46 : vector<2x32xf32> to vector<1x2x32xf32>
    tpu.vector_store %arg12[%47, %c0_23, %c0_24], %50 {strides = array<i32>} : memref<8x2x32xf32, #tpu.memory_space<vmem>>, vector<1x2x32xf32>,
    %c1_i32 = arith.constant 1 : i32
    %51 = arith.index_cast %c1_i32 : i32 to index
    %c0_25 = arith.constant 0 : index
    %c0_26 = arith.constant 0 : index
    %52 = vector.load %arg11[%51, %c0_25, %c0_26] : memref<8x2x96xf32, #tpu.memory_space<vmem>>, vector<1x2x96xf32>
    %53 = vector.shape_cast %52 : vector<1x2x96xf32> to vector<2x96xf32>
    %cst_27 = arith.constant dense<0.000000e+00> : vector<2x96xf32>
    %54 = tpu.matmul %46, %12, %cst_27 {dimension_numbers = #tpu.dot_dimension_numbers<[1], [0], [0], [1], [0, 0, 1, 1], [], []>} : vector<2x32xf32>, vector<32x96xf32>, vector<2x96xf32> -> vector<2x96xf32>
    %55 = vector.extract_strided_slice %53 {offsets = [0, 0], sizes = [2, 32], strides = [1, 1]} : vector<2x96xf32> to vector<2x32xf32>
    %56 = vector.extract_strided_slice %54 {offsets = [0, 0], sizes = [2, 32], strides = [1, 1]} : vector<2x96xf32> to vector<2x32xf32>
    %57 = arith.addf %55, %56 : vector<2x32xf32>
    %58 = arith.negf %57 : vector<2x32xf32>
    %59 = math.exp %58 : vector<2x32xf32>
    %cst_28 = arith.constant 1.000000e+00 : f32
    %60 = vector.broadcast %cst_28 : f32 to vector<2x32xf32>
    %61 = arith.addf %60, %59 : vector<2x32xf32>
    %62 = arith.divf %60, %61 : vector<2x32xf32>
    %63 = vector.extract_strided_slice %53 {offsets = [0, 32], sizes = [2, 32], strides = [1, 1]} : vector<2x96xf32> to vector<2x32xf32>
    %64 = vector.extract_strided_slice %54 {offsets = [0, 32], sizes = [2, 32], strides = [1, 1]} : vector<2x96xf32> to vector<2x32xf32>
    %65 = arith.addf %63, %64 : vector<2x32xf32>
    %66 = arith.negf %65 : vector<2x32xf32>
    %67 = math.exp %66 : vector<2x32xf32>
    %cst_29 = arith.constant 1.000000e+00 : f32
    %68 = vector.broadcast %cst_29 : f32 to vector<2x32xf32>
    %69 = arith.addf %68, %67 : vector<2x32xf32>
    %70 = arith.divf %68, %69 : vector<2x32xf32>
    %71 = vector.extract_strided_slice %53 {offsets = [0, 64], sizes = [2, 32], strides = [1, 1]} : vector<2x96xf32> to vector<2x32xf32>
    %72 = vector.extract_strided_slice %54 {offsets = [0, 64], sizes = [2, 32], strides = [1, 1]} : vector<2x96xf32> to vector<2x32xf32>
    %73 = vector.broadcast %13 : vector<1x32xf32> to vector<2x32xf32>
    %74 = arith.addf %72, %73 : vector<2x32xf32>
    %75 = arith.mulf %62, %74 : vector<2x32xf32>
    %76 = arith.addf %71, %75 : vector<2x32xf32>
    %77 = math.tanh %76 : vector<2x32xf32>
    %cst_30 = arith.constant 1.000000e+00 : f32
    %78 = vector.broadcast %cst_30 : f32 to vector<2x32xf32>
    %79 = arith.subf %78, %70 : vector<2x32xf32>
    %80 = arith.mulf %79, %77 : vector<2x32xf32>
    %81 = arith.mulf %70, %46 : vector<2x32xf32>
    %82 = arith.addf %80, %81 : vector<2x32xf32>
    %83 = arith.index_cast %c1_i32 : i32 to index
    %c0_31 = arith.constant 0 : index
    %c0_32 = arith.constant 0 : index
    %84 = vector.load %arg12[%83, %c0_31, %c0_32] : memref<8x2x32xf32, #tpu.memory_space<vmem>>, vector<1x2x32xf32>
    %85 = vector.shape_cast %84 : vector<1x2x32xf32> to vector<2x32xf32>
    %86 = vector.shape_cast %82 : vector<2x32xf32> to vector<1x2x32xf32>
    tpu.vector_store %arg12[%83, %c0_31, %c0_32], %86 {strides = array<i32>} : memref<8x2x32xf32, #tpu.memory_space<vmem>>, vector<1x2x32xf32>,
    %c2_i32 = arith.constant 2 : i32
    %87 = arith.index_cast %c2_i32 : i32 to index
    %c0_33 = arith.constant 0 : index
    %c0_34 = arith.constant 0 : index
    %88 = vector.load %arg11[%87, %c0_33, %c0_34] : memref<8x2x96xf32, #tpu.memory_space<vmem>>, vector<1x2x96xf32>
    %89 = vector.shape_cast %88 : vector<1x2x96xf32> to vector<2x96xf32>
    %cst_35 = arith.constant dense<0.000000e+00> : vector<2x96xf32>
    %90 = tpu.matmul %82, %12, %cst_35 {dimension_numbers = #tpu.dot_dimension_numbers<[1], [0], [0], [1], [0, 0, 1, 1], [], []>} : vector<2x32xf32>, vector<32x96xf32>, vector<2x96xf32> -> vector<2x96xf32>
    %91 = vector.extract_strided_slice %89 {offsets = [0, 0], sizes = [2, 32], strides = [1, 1]} : vector<2x96xf32> to vector<2x32xf32>
    %92 = vector.extract_strided_slice %90 {offsets = [0, 0], sizes = [2, 32], strides = [1, 1]} : vector<2x96xf32> to vector<2x32xf32>
    %93 = arith.addf %91, %92 : vector<2x32xf32>
    %94 = arith.negf %93 : vector<2x32xf32>
    %95 = math.exp %94 : vector<2x32xf32>
    %cst_36 = arith.constant 1.000000e+00 : f32
    %96 = vector.broadcast %cst_36 : f32 to vector<2x32xf32>
    %97 = arith.addf %96, %95 : vector<2x32xf32>
    %98 = arith.divf %96, %97 : vector<2x32xf32>
    %99 = vector.extract_strided_slice %89 {offsets = [0, 32], sizes = [2, 32], strides = [1, 1]} : vector<2x96xf32> to vector<2x32xf32>
    %100 = vector.extract_strided_slice %90 {offsets = [0, 32], sizes = [2, 32], strides = [1, 1]} : vector<2x96xf32> to vector<2x32xf32>
    %101 = arith.addf %99, %100 : vector<2x32xf32>
    %102 = arith.negf %101 : vector<2x32xf32>
    %103 = math.exp %102 : vector<2x32xf32>
    %cst_37 = arith.constant 1.000000e+00 : f32
    %104 = vector.broadcast %cst_37 : f32 to vector<2x32xf32>
    %105 = arith.addf %104, %103 : vector<2x32xf32>
    %106 = arith.divf %104, %105 : vector<2x32xf32>
    %107 = vector.extract_strided_slice %89 {offsets = [0, 64], sizes = [2, 32], strides = [1, 1]} : vector<2x96xf32> to vector<2x32xf32>
    %108 = vector.extract_strided_slice %90 {offsets = [0, 64], sizes = [2, 32], strides = [1, 1]} : vector<2x96xf32> to vector<2x32xf32>
    %109 = vector.broadcast %13 : vector<1x32xf32> to vector<2x32xf32>
    %110 = arith.addf %108, %109 : vector<2x32xf32>
    %111 = arith.mulf %98, %110 : vector<2x32xf32>
    %112 = arith.addf %107, %111 : vector<2x32xf32>
    %113 = math.tanh %112 : vector<2x32xf32>
    %cst_38 = arith.constant 1.000000e+00 : f32
    %114 = vector.broadcast %cst_38 : f32 to vector<2x32xf32>
    %115 = arith.subf %114, %106 : vector<2x32xf32>
    %116 = arith.mulf %115, %113 : vector<2x32xf32>
    %117 = arith.mulf %106, %82 : vector<2x32xf32>
    %118 = arith.addf %116, %117 : vector<2x32xf32>
    %119 = arith.index_cast %c2_i32 : i32 to index
    %c0_39 = arith.constant 0 : index
    %c0_40 = arith.constant 0 : index
    %120 = vector.load %arg12[%119, %c0_39, %c0_40] : memref<8x2x32xf32, #tpu.memory_space<vmem>>, vector<1x2x32xf32>
    %121 = vector.shape_cast %120 : vector<1x2x32xf32> to vector<2x32xf32>
    %122 = vector.shape_cast %118 : vector<2x32xf32> to vector<1x2x32xf32>
    tpu.vector_store %arg12[%119, %c0_39, %c0_40], %122 {strides = array<i32>} : memref<8x2x32xf32, #tpu.memory_space<vmem>>, vector<1x2x32xf32>,
    %c3_i32 = arith.constant 3 : i32
    %123 = arith.index_cast %c3_i32 : i32 to index
    %c0_41 = arith.constant 0 : index
    %c0_42 = arith.constant 0 : index
    %124 = vector.load %arg11[%123, %c0_41, %c0_42] : memref<8x2x96xf32, #tpu.memory_space<vmem>>, vector<1x2x96xf32>
    %125 = vector.shape_cast %124 : vector<1x2x96xf32> to vector<2x96xf32>
    %cst_43 = arith.constant dense<0.000000e+00> : vector<2x96xf32>
    %126 = tpu.matmul %118, %12, %cst_43 {dimension_numbers = #tpu.dot_dimension_numbers<[1], [0], [0], [1], [0, 0, 1, 1], [], []>} : vector<2x32xf32>, vector<32x96xf32>, vector<2x96xf32> -> vector<2x96xf32>
    %127 = vector.extract_strided_slice %125 {offsets = [0, 0], sizes = [2, 32], strides = [1, 1]} : vector<2x96xf32> to vector<2x32xf32>
    %128 = vector.extract_strided_slice %126 {offsets = [0, 0], sizes = [2, 32], strides = [1, 1]} : vector<2x96xf32> to vector<2x32xf32>
    %129 = arith.addf %127, %128 : vector<2x32xf32>
    %130 = arith.negf %129 : vector<2x32xf32>
    %131 = math.exp %130 : vector<2x32xf32>
    %cst_44 = arith.constant 1.000000e+00 : f32
    %132 = vector.broadcast %cst_44 : f32 to vector<2x32xf32>
    %133 = arith.addf %132, %131 : vector<2x32xf32>
    %134 = arith.divf %132, %133 : vector<2x32xf32>
    %135 = vector.extract_strided_slice %125 {offsets = [0, 32], sizes = [2, 32], strides = [1, 1]} : vector<2x96xf32> to vector<2x32xf32>
    %136 = vector.extract_strided_slice %126 {offsets = [0, 32], sizes = [2, 32], strides = [1, 1]} : vector<2x96xf32> to vector<2x32xf32>
    %137 = arith.addf %135, %136 : vector<2x32xf32>
    %138 = arith.negf %137 : vector<2x32xf32>
    %139 = math.exp %138 : vector<2x32xf32>
    %cst_45 = arith.constant 1.000000e+00 : f32
    %140 = vector.broadcast %cst_45 : f32 to vector<2x32xf32>
    %141 = arith.addf %140, %139 : vector<2x32xf32>
    %142 = arith.divf %140, %141 : vector<2x32xf32>
    %143 = vector.extract_strided_slice %125 {offsets = [0, 64], sizes = [2, 32], strides = [1, 1]} : vector<2x96xf32> to vector<2x32xf32>
    %144 = vector.extract_strided_slice %126 {offsets = [0, 64], sizes = [2, 32], strides = [1, 1]} : vector<2x96xf32> to vector<2x32xf32>
    %145 = vector.broadcast %13 : vector<1x32xf32> to vector<2x32xf32>
    %146 = arith.addf %144, %145 : vector<2x32xf32>
    %147 = arith.mulf %134, %146 : vector<2x32xf32>
    %148 = arith.addf %143, %147 : vector<2x32xf32>
    %149 = math.tanh %148 : vector<2x32xf32>
    %cst_46 = arith.constant 1.000000e+00 : f32
    %150 = vector.broadcast %cst_46 : f32 to vector<2x32xf32>
    %151 = arith.subf %150, %142 : vector<2x32xf32>
    %152 = arith.mulf %151, %149 : vector<2x32xf32>
    %153 = arith.mulf %142, %118 : vector<2x32xf32>
    %154 = arith.addf %152, %153 : vector<2x32xf32>
    %155 = arith.index_cast %c3_i32 : i32 to index
    %c0_47 = arith.constant 0 : index
    %c0_48 = arith.constant 0 : index
    %156 = vector.load %arg12[%155, %c0_47, %c0_48] : memref<8x2x32xf32, #tpu.memory_space<vmem>>, vector<1x2x32xf32>
    %157 = vector.shape_cast %156 : vector<1x2x32xf32> to vector<2x32xf32>
    %158 = vector.shape_cast %154 : vector<2x32xf32> to vector<1x2x32xf32>
    tpu.vector_store %arg12[%155, %c0_47, %c0_48], %158 {strides = array<i32>} : memref<8x2x32xf32, #tpu.memory_space<vmem>>, vector<1x2x32xf32>,
    %c4_i32 = arith.constant 4 : i32
    %159 = arith.index_cast %c4_i32 : i32 to index
    %c0_49 = arith.constant 0 : index
    %c0_50 = arith.constant 0 : index
    %160 = vector.load %arg11[%159, %c0_49, %c0_50] : memref<8x2x96xf32, #tpu.memory_space<vmem>>, vector<1x2x96xf32>
    %161 = vector.shape_cast %160 : vector<1x2x96xf32> to vector<2x96xf32>
    %cst_51 = arith.constant dense<0.000000e+00> : vector<2x96xf32>
    %162 = tpu.matmul %154, %12, %cst_51 {dimension_numbers = #tpu.dot_dimension_numbers<[1], [0], [0], [1], [0, 0, 1, 1], [], []>} : vector<2x32xf32>, vector<32x96xf32>, vector<2x96xf32> -> vector<2x96xf32>
    %163 = vector.extract_strided_slice %161 {offsets = [0, 0], sizes = [2, 32], strides = [1, 1]} : vector<2x96xf32> to vector<2x32xf32>
    %164 = vector.extract_strided_slice %162 {offsets = [0, 0], sizes = [2, 32], strides = [1, 1]} : vector<2x96xf32> to vector<2x32xf32>
    %165 = arith.addf %163, %164 : vector<2x32xf32>
    %166 = arith.negf %165 : vector<2x32xf32>
    %167 = math.exp %166 : vector<2x32xf32>
    %cst_52 = arith.constant 1.000000e+00 : f32
    %168 = vector.broadcast %cst_52 : f32 to vector<2x32xf32>
    %169 = arith.addf %168, %167 : vector<2x32xf32>
    %170 = arith.divf %168, %169 : vector<2x32xf32>
    %171 = vector.extract_strided_slice %161 {offsets = [0, 32], sizes = [2, 32], strides = [1, 1]} : vector<2x96xf32> to vector<2x32xf32>
    %172 = vector.extract_strided_slice %162 {offsets = [0, 32], sizes = [2, 32], strides = [1, 1]} : vector<2x96xf32> to vector<2x32xf32>
    %173 = arith.addf %171, %172 : vector<2x32xf32>
    %174 = arith.negf %173 : vector<2x32xf32>
    %175 = math.exp %174 : vector<2x32xf32>
    %cst_53 = arith.constant 1.000000e+00 : f32
    %176 = vector.broadcast %cst_53 : f32 to vector<2x32xf32>
    %177 = arith.addf %176, %175 : vector<2x32xf32>
    %178 = arith.divf %176, %177 : vector<2x32xf32>
    %179 = vector.extract_strided_slice %161 {offsets = [0, 64], sizes = [2, 32], strides = [1, 1]} : vector<2x96xf32> to vector<2x32xf32>
    %180 = vector.extract_strided_slice %162 {offsets = [0, 64], sizes = [2, 32], strides = [1, 1]} : vector<2x96xf32> to vector<2x32xf32>
    %181 = vector.broadcast %13 : vector<1x32xf32> to vector<2x32xf32>
    %182 = arith.addf %180, %181 : vector<2x32xf32>
    %183 = arith.mulf %170, %182 : vector<2x32xf32>
    %184 = arith.addf %179, %183 : vector<2x32xf32>
    %185 = math.tanh %184 : vector<2x32xf32>
    %cst_54 = arith.constant 1.000000e+00 : f32
    %186 = vector.broadcast %cst_54 : f32 to vector<2x32xf32>
    %187 = arith.subf %186, %178 : vector<2x32xf32>
    %188 = arith.mulf %187, %185 : vector<2x32xf32>
    %189 = arith.mulf %178, %154 : vector<2x32xf32>
    %190 = arith.addf %188, %189 : vector<2x32xf32>
    %191 = arith.index_cast %c4_i32 : i32 to index
    %c0_55 = arith.constant 0 : index
    %c0_56 = arith.constant 0 : index
    %192 = vector.load %arg12[%191, %c0_55, %c0_56] : memref<8x2x32xf32, #tpu.memory_space<vmem>>, vector<1x2x32xf32>
    %193 = vector.shape_cast %192 : vector<1x2x32xf32> to vector<2x32xf32>
    %194 = vector.shape_cast %190 : vector<2x32xf32> to vector<1x2x32xf32>
    tpu.vector_store %arg12[%191, %c0_55, %c0_56], %194 {strides = array<i32>} : memref<8x2x32xf32, #tpu.memory_space<vmem>>, vector<1x2x32xf32>,
    %c5_i32 = arith.constant 5 : i32
    %195 = arith.index_cast %c5_i32 : i32 to index
    %c0_57 = arith.constant 0 : index
    %c0_58 = arith.constant 0 : index
    %196 = vector.load %arg11[%195, %c0_57, %c0_58] : memref<8x2x96xf32, #tpu.memory_space<vmem>>, vector<1x2x96xf32>
    %197 = vector.shape_cast %196 : vector<1x2x96xf32> to vector<2x96xf32>
    %cst_59 = arith.constant dense<0.000000e+00> : vector<2x96xf32>
    %198 = tpu.matmul %190, %12, %cst_59 {dimension_numbers = #tpu.dot_dimension_numbers<[1], [0], [0], [1], [0, 0, 1, 1], [], []>} : vector<2x32xf32>, vector<32x96xf32>, vector<2x96xf32> -> vector<2x96xf32>
    %199 = vector.extract_strided_slice %197 {offsets = [0, 0], sizes = [2, 32], strides = [1, 1]} : vector<2x96xf32> to vector<2x32xf32>
    %200 = vector.extract_strided_slice %198 {offsets = [0, 0], sizes = [2, 32], strides = [1, 1]} : vector<2x96xf32> to vector<2x32xf32>
    %201 = arith.addf %199, %200 : vector<2x32xf32>
    %202 = arith.negf %201 : vector<2x32xf32>
    %203 = math.exp %202 : vector<2x32xf32>
    %cst_60 = arith.constant 1.000000e+00 : f32
    %204 = vector.broadcast %cst_60 : f32 to vector<2x32xf32>
    %205 = arith.addf %204, %203 : vector<2x32xf32>
    %206 = arith.divf %204, %205 : vector<2x32xf32>
    %207 = vector.extract_strided_slice %197 {offsets = [0, 32], sizes = [2, 32], strides = [1, 1]} : vector<2x96xf32> to vector<2x32xf32>
    %208 = vector.extract_strided_slice %198 {offsets = [0, 32], sizes = [2, 32], strides = [1, 1]} : vector<2x96xf32> to vector<2x32xf32>
    %209 = arith.addf %207, %208 : vector<2x32xf32>
    %210 = arith.negf %209 : vector<2x32xf32>
    %211 = math.exp %210 : vector<2x32xf32>
    %cst_61 = arith.constant 1.000000e+00 : f32
    %212 = vector.broadcast %cst_61 : f32 to vector<2x32xf32>
    %213 = arith.addf %212, %211 : vector<2x32xf32>
    %214 = arith.divf %212, %213 : vector<2x32xf32>
    %215 = vector.extract_strided_slice %197 {offsets = [0, 64], sizes = [2, 32], strides = [1, 1]} : vector<2x96xf32> to vector<2x32xf32>
    %216 = vector.extract_strided_slice %198 {offsets = [0, 64], sizes = [2, 32], strides = [1, 1]} : vector<2x96xf32> to vector<2x32xf32>
    %217 = vector.broadcast %13 : vector<1x32xf32> to vector<2x32xf32>
    %218 = arith.addf %216, %217 : vector<2x32xf32>
    %219 = arith.mulf %206, %218 : vector<2x32xf32>
    %220 = arith.addf %215, %219 : vector<2x32xf32>
    %221 = math.tanh %220 : vector<2x32xf32>
    %cst_62 = arith.constant 1.000000e+00 : f32
    %222 = vector.broadcast %cst_62 : f32 to vector<2x32xf32>
    %223 = arith.subf %222, %214 : vector<2x32xf32>
    %224 = arith.mulf %223, %221 : vector<2x32xf32>
    %225 = arith.mulf %214, %190 : vector<2x32xf32>
    %226 = arith.addf %224, %225 : vector<2x32xf32>
    %227 = arith.index_cast %c5_i32 : i32 to index
    %c0_63 = arith.constant 0 : index
    %c0_64 = arith.constant 0 : index
    %228 = vector.load %arg12[%227, %c0_63, %c0_64] : memref<8x2x32xf32, #tpu.memory_space<vmem>>, vector<1x2x32xf32>
    %229 = vector.shape_cast %228 : vector<1x2x32xf32> to vector<2x32xf32>
    %230 = vector.shape_cast %226 : vector<2x32xf32> to vector<1x2x32xf32>
    tpu.vector_store %arg12[%227, %c0_63, %c0_64], %230 {strides = array<i32>} : memref<8x2x32xf32, #tpu.memory_space<vmem>>, vector<1x2x32xf32>,
    %c6_i32 = arith.constant 6 : i32
    %231 = arith.index_cast %c6_i32 : i32 to index
    %c0_65 = arith.constant 0 : index
    %c0_66 = arith.constant 0 : index
    %232 = vector.load %arg11[%231, %c0_65, %c0_66] : memref<8x2x96xf32, #tpu.memory_space<vmem>>, vector<1x2x96xf32>
    %233 = vector.shape_cast %232 : vector<1x2x96xf32> to vector<2x96xf32>
    %cst_67 = arith.constant dense<0.000000e+00> : vector<2x96xf32>
    %234 = tpu.matmul %226, %12, %cst_67 {dimension_numbers = #tpu.dot_dimension_numbers<[1], [0], [0], [1], [0, 0, 1, 1], [], []>} : vector<2x32xf32>, vector<32x96xf32>, vector<2x96xf32> -> vector<2x96xf32>
    %235 = vector.extract_strided_slice %233 {offsets = [0, 0], sizes = [2, 32], strides = [1, 1]} : vector<2x96xf32> to vector<2x32xf32>
    %236 = vector.extract_strided_slice %234 {offsets = [0, 0], sizes = [2, 32], strides = [1, 1]} : vector<2x96xf32> to vector<2x32xf32>
    %237 = arith.addf %235, %236 : vector<2x32xf32>
    %238 = arith.negf %237 : vector<2x32xf32>
    %239 = math.exp %238 : vector<2x32xf32>
    %cst_68 = arith.constant 1.000000e+00 : f32
    %240 = vector.broadcast %cst_68 : f32 to vector<2x32xf32>
    %241 = arith.addf %240, %239 : vector<2x32xf32>
    %242 = arith.divf %240, %241 : vector<2x32xf32>
    %243 = vector.extract_strided_slice %233 {offsets = [0, 32], sizes = [2, 32], strides = [1, 1]} : vector<2x96xf32> to vector<2x32xf32>
    %244 = vector.extract_strided_slice %234 {offsets = [0, 32], sizes = [2, 32], strides = [1, 1]} : vector<2x96xf32> to vector<2x32xf32>
    %245 = arith.addf %243, %244 : vector<2x32xf32>
    %246 = arith.negf %245 : vector<2x32xf32>
    %247 = math.exp %246 : vector<2x32xf32>
    %cst_69 = arith.constant 1.000000e+00 : f32
    %248 = vector.broadcast %cst_69 : f32 to vector<2x32xf32>
    %249 = arith.addf %248, %247 : vector<2x32xf32>
    %250 = arith.divf %248, %249 : vector<2x32xf32>
    %251 = vector.extract_strided_slice %233 {offsets = [0, 64], sizes = [2, 32], strides = [1, 1]} : vector<2x96xf32> to vector<2x32xf32>
    %252 = vector.extract_strided_slice %234 {offsets = [0, 64], sizes = [2, 32], strides = [1, 1]} : vector<2x96xf32> to vector<2x32xf32>
    %253 = vector.broadcast %13 : vector<1x32xf32> to vector<2x32xf32>
    %254 = arith.addf %252, %253 : vector<2x32xf32>
    %255 = arith.mulf %242, %254 : vector<2x32xf32>
    %256 = arith.addf %251, %255 : vector<2x32xf32>
    %257 = math.tanh %256 : vector<2x32xf32>
    %cst_70 = arith.constant 1.000000e+00 : f32
    %258 = vector.broadcast %cst_70 : f32 to vector<2x32xf32>
    %259 = arith.subf %258, %250 : vector<2x32xf32>
    %260 = arith.mulf %259, %257 : vector<2x32xf32>
    %261 = arith.mulf %250, %226 : vector<2x32xf32>
    %262 = arith.addf %260, %261 : vector<2x32xf32>
    %263 = arith.index_cast %c6_i32 : i32 to index
    %c0_71 = arith.constant 0 : index
    %c0_72 = arith.constant 0 : index
    %264 = vector.load %arg12[%263, %c0_71, %c0_72] : memref<8x2x32xf32, #tpu.memory_space<vmem>>, vector<1x2x32xf32>
    %265 = vector.shape_cast %264 : vector<1x2x32xf32> to vector<2x32xf32>
    %266 = vector.shape_cast %262 : vector<2x32xf32> to vector<1x2x32xf32>
    tpu.vector_store %arg12[%263, %c0_71, %c0_72], %266 {strides = array<i32>} : memref<8x2x32xf32, #tpu.memory_space<vmem>>, vector<1x2x32xf32>,
    %c7_i32 = arith.constant 7 : i32
    %267 = arith.index_cast %c7_i32 : i32 to index
    %c0_73 = arith.constant 0 : index
    %c0_74 = arith.constant 0 : index
    %268 = vector.load %arg11[%267, %c0_73, %c0_74] : memref<8x2x96xf32, #tpu.memory_space<vmem>>, vector<1x2x96xf32>
    %269 = vector.shape_cast %268 : vector<1x2x96xf32> to vector<2x96xf32>
    %cst_75 = arith.constant dense<0.000000e+00> : vector<2x96xf32>
    %270 = tpu.matmul %262, %12, %cst_75 {dimension_numbers = #tpu.dot_dimension_numbers<[1], [0], [0], [1], [0, 0, 1, 1], [], []>} : vector<2x32xf32>, vector<32x96xf32>, vector<2x96xf32> -> vector<2x96xf32>
    %271 = vector.extract_strided_slice %269 {offsets = [0, 0], sizes = [2, 32], strides = [1, 1]} : vector<2x96xf32> to vector<2x32xf32>
    %272 = vector.extract_strided_slice %270 {offsets = [0, 0], sizes = [2, 32], strides = [1, 1]} : vector<2x96xf32> to vector<2x32xf32>
    %273 = arith.addf %271, %272 : vector<2x32xf32>
    %274 = arith.negf %273 : vector<2x32xf32>
    %275 = math.exp %274 : vector<2x32xf32>
    %cst_76 = arith.constant 1.000000e+00 : f32
    %276 = vector.broadcast %cst_76 : f32 to vector<2x32xf32>
    %277 = arith.addf %276, %275 : vector<2x32xf32>
    %278 = arith.divf %276, %277 : vector<2x32xf32>
    %279 = vector.extract_strided_slice %269 {offsets = [0, 32], sizes = [2, 32], strides = [1, 1]} : vector<2x96xf32> to vector<2x32xf32>
    %280 = vector.extract_strided_slice %270 {offsets = [0, 32], sizes = [2, 32], strides = [1, 1]} : vector<2x96xf32> to vector<2x32xf32>
    %281 = arith.addf %279, %280 : vector<2x32xf32>
    %282 = arith.negf %281 : vector<2x32xf32>
    %283 = math.exp %282 : vector<2x32xf32>
    %cst_77 = arith.constant 1.000000e+00 : f32
    %284 = vector.broadcast %cst_77 : f32 to vector<2x32xf32>
    %285 = arith.addf %284, %283 : vector<2x32xf32>
    %286 = arith.divf %284, %285 : vector<2x32xf32>
    %287 = vector.extract_strided_slice %269 {offsets = [0, 64], sizes = [2, 32], strides = [1, 1]} : vector<2x96xf32> to vector<2x32xf32>
    %288 = vector.extract_strided_slice %270 {offsets = [0, 64], sizes = [2, 32], strides = [1, 1]} : vector<2x96xf32> to vector<2x32xf32>
    %289 = vector.broadcast %13 : vector<1x32xf32> to vector<2x32xf32>
    %290 = arith.addf %288, %289 : vector<2x32xf32>
    %291 = arith.mulf %278, %290 : vector<2x32xf32>
    %292 = arith.addf %287, %291 : vector<2x32xf32>
    %293 = math.tanh %292 : vector<2x32xf32>
    %cst_78 = arith.constant 1.000000e+00 : f32
    %294 = vector.broadcast %cst_78 : f32 to vector<2x32xf32>
    %295 = arith.subf %294, %286 : vector<2x32xf32>
    %296 = arith.mulf %295, %293 : vector<2x32xf32>
    %297 = arith.mulf %286, %262 : vector<2x32xf32>
    %298 = arith.addf %296, %297 : vector<2x32xf32>
    %299 = arith.index_cast %c7_i32 : i32 to index
    %c0_79 = arith.constant 0 : index
    %c0_80 = arith.constant 0 : index
    %300 = vector.load %arg12[%299, %c0_79, %c0_80] : memref<8x2x32xf32, #tpu.memory_space<vmem>>, vector<1x2x32xf32>
    %301 = vector.shape_cast %300 : vector<1x2x32xf32> to vector<2x32xf32>
    %302 = vector.shape_cast %298 : vector<2x32xf32> to vector<1x2x32xf32>
    tpu.vector_store %arg12[%299, %c0_79, %c0_80], %302 {strides = array<i32>} : memref<8x2x32xf32, #tpu.memory_space<vmem>>, vector<1x2x32xf32>,
    %c8_i32 = arith.constant 8 : i32
    %c0_81 = arith.constant 0 : index
    %c0_82 = arith.constant 0 : index
    %303 = vector.load %arg10[%c0_81, %c0_82] : memref<2x32xf32, #tpu.memory_space<vmem>>, vector<2x32xf32>
    tpu.vector_store %arg10[%c0_81, %c0_82], %298 {strides = array<i32>} : memref<2x32xf32, #tpu.memory_space<vmem>>, vector<2x32xf32>,
    %c0_83 = arith.constant 0 : index
    %c0_84 = arith.constant 0 : index
    %304 = vector.load %arg7[%c0_83, %c0_84] : memref<1x32xf32, #tpu.memory_space<vmem>>, vector<1x32xf32>
    %305 = vector.shape_cast %304 : vector<1x32xf32> to vector<1x1x32xf32>
    %c0_85 = arith.constant 0 : index
    %c0_86 = arith.constant 0 : index
    %c0_87 = arith.constant 0 : index
    %306 = vector.load %arg12[%c0_85, %c0_86, %c0_87] : memref<8x2x32xf32, #tpu.memory_space<vmem>>, vector<8x2x32xf32>
    %307 = vector.broadcast %305 : vector<1x1x32xf32> to vector<8x2x32xf32>
    %308 = arith.mulf %306, %307 : vector<8x2x32xf32>
    %cst_88 = arith.constant dense<0.000000e+00> : vector<8x2xf32>
    %309 = vector.multi_reduction <add>, %308, %cst_88 [2] : vector<8x2x32xf32> to vector<8x2xf32>
    %c0_89 = arith.constant 0 : index
    %c0_90 = arith.constant 0 : index
    %310 = vector.load %arg8[%c0_89, %c0_90] : memref<1x1xf32, #tpu.memory_space<vmem>>, vector<1x1xf32>
    %311 = vector.broadcast %310 : vector<1x1xf32> to vector<8x2xf32>
    %312 = arith.addf %309, %311 : vector<8x2xf32>
    %313 = tpu.transpose %312, [1, 0] : vector<8x2xf32> -> vector<2x8xf32>
    %c0_91 = arith.constant 0 : index
    %c0_92 = arith.constant 0 : index
    %314 = vector.load %arg9[%c0_91, %c0_92] : memref<2x8xf32, #tpu.memory_space<vmem>>, vector<2x8xf32>
    tpu.vector_store %arg9[%c0_91, %c0_92], %313 {strides = array<i32>} : memref<2x8xf32, #tpu.memory_space<vmem>>, vector<2x8xf32>,
    return
  }
  func.func @transform_0(%arg0: i32, %arg1: i32) -> (i32, i32, i32) {
    %c0_i32 = arith.constant 0 : i32
    %c0_i32_0 = arith.constant 0 : i32
    return %arg1, %arg0, %c0_i32 : i32, i32, i32
  }
  func.func @transform_1(%arg0: i32, %arg1: i32) -> (i32, i32) {
    %c0_i32 = arith.constant 0 : i32
    %c0_i32_0 = arith.constant 0 : i32
    %c0_i32_1 = arith.constant 0 : i32
    return %c0_i32, %c0_i32_0 : i32, i32
  }
  func.func @transform_2(%arg0: i32, %arg1: i32) -> (i32, i32) {
    %c0_i32 = arith.constant 0 : i32
    %c0_i32_0 = arith.constant 0 : i32
    %c0_i32_1 = arith.constant 0 : i32
    return %c0_i32, %c0_i32_0 : i32, i32
  }
  func.func @transform_3(%arg0: i32, %arg1: i32) -> (i32, i32) {
    %c0_i32 = arith.constant 0 : i32
    %c0_i32_0 = arith.constant 0 : i32
    %c0_i32_1 = arith.constant 0 : i32
    return %c0_i32, %c0_i32_0 : i32, i32
  }
  func.func @transform_4(%arg0: i32, %arg1: i32) -> (i32, i32) {
    %c0_i32 = arith.constant 0 : i32
    %c0_i32_0 = arith.constant 0 : i32
    %c0_i32_1 = arith.constant 0 : i32
    return %c0_i32, %c0_i32_0 : i32, i32
  }
  func.func @transform_5(%arg0: i32, %arg1: i32) -> (i32, i32) {
    %c0_i32 = arith.constant 0 : i32
    %c0_i32_0 = arith.constant 0 : i32
    %c0_i32_1 = arith.constant 0 : i32
    return %c0_i32, %c0_i32_0 : i32, i32
  }
  func.func @transform_6(%arg0: i32, %arg1: i32) -> (i32, i32) {
    %c0_i32 = arith.constant 0 : i32
    %c0_i32_0 = arith.constant 0 : i32
    %c0_i32_1 = arith.constant 0 : i32
    return %c0_i32, %c0_i32_0 : i32, i32
  }
  func.func @transform_7(%arg0: i32, %arg1: i32) -> (i32, i32) {
    %c0_i32 = arith.constant 0 : i32
    return %arg0, %arg1 : i32, i32
  }
}

</mosaic_0001>

<bundles_post_ra>
// kernel: tpu_custom_call.1
= control target key start
LH: loop header
LB: loop body
LE: loop exit
PB: predicated region body
PF: predicated region fallthrough
CT: control target
= control target key end

     0   :  { %s1237_s0 = inlined_call_operand.hbm [shape: f32[8,2,8], index: 0, kind: input, shape index: {}]   ;;  %s1238_s1 = inlined_call_operand.hbm [shape: f32[8,96], index: 1, kind: input, shape index: {}]   ;;  %s1239_s2 = inlined_call_operand.hbm [shape: f32[32,96], index: 2, kind: input, shape index: {}]   ;;  %s1240_s3 = inlined_call_operand.vmem [shape: f32[1,96], index: 3, kind: input, shape index: {}]   ;;  %s1241_s4 = inlined_call_operand.vmem [shape: f32[1,32], index: 4, kind: input, shape index: {}]   ;;  %s1242_s5 = inlined_call_operand.vmem [shape: f32[1,32], index: 5, kind: input, shape index: {}]   ;;  %s1243_s6 = inlined_call_operand.<no memory space> [shape: f32[1,1], index: 6, kind: input, shape index: {}]   ;;  %s1244_s7 = inlined_call_operand.hbm [shape: f32[2,8], index: 7, kind: output, shape index: {}]  }
   0x1   :  { %v12_v0 = vstv %s1243_s6 }
   0x2   :  { %13 = vst [vmem:[#allocation5] sm:$0x1] %v12_v0 }
   0x3   :  { %14 = vsyncpa [#allocation7], 0 }
   0x4   :  { %15 = vsyncpa [#allocation10], 0  ;;  %s35_s28 = sshll.u32 %s1238_s1, 4  ;;  %s36_s28 = int_to_ptr.hbm [resolvable:$true] %s35_s28 }
   0x5   :  { %16 = vsyncpa [#allocation8], 0  ;;  %s1075_s29 = smov [#allocation9]   ;;  %s21_s10 = sshll.u32 %s1237_s0, 4  ;;  %s22_s10 = int_to_ptr.hbm [resolvable:$true] %s21_s10 }
   0x6   :  { %s37_s30 = sshll.u32 %s1075_s29, 4  ;;  %s1076_s11 = smov [#allocation6]   ;;  %s38_s30 = int_to_ptr.vmem [resolvable:$true] %s37_s30 }
   0x7   :  { %40 = dma.hbm_to_vmem [thread:$0]  %s36_s28, 128, %s38_s30, [#allocation10]  }
   0x8   :  { %s23_s6 = sshll.u32 %s1076_s11, 4  ;;  %s1077_s12 = smov 32   ;;  %s24_s6 = int_to_ptr.vmem [resolvable:$true] %s23_s6 }
   0x9   :  { %s1078_s13 = smov 2   ;;  %s45_s15 = sshll.u32 %s1239_s2, 4  ;;  %s46_s15 = int_to_ptr.hbm [resolvable:$true] %s45_s15 }
   0xa   :  { %29 = dma.hbm_to_vmem [thread:$0]  %s22_s10, 256, %s24_s6, [#allocation7], %s1077_s12, %s1077_s12, %s1078_s13  }
   0xb   :  { %s1079_s16 = smov [#allocation11]   ;;  %s1080_s18 = smov 128  }
   0xc   :  { %s47_s17 = sshll.u32 %s1079_s16, 4  ;;  %s1081_s0 = smov 8   ;;  %s48_s17 = int_to_ptr.vmem [resolvable:$true] %s47_s17 }
   0xd   :  { %53 = dma.hbm_to_vmem [thread:$0]  %s46_s15, 512, %s48_s17, [#allocation10], %s1080_s18, %s1080_s18, %s1081_s0  }
   0xe   :  { %1069 = dma.done.wait [#allocation7], 256  }
   0xf   :  { %1070 = vsyncadd [#allocation7], 4294967040 }
  0x10   :  { %1071 = dma.done.wait [#allocation10], 640  }
  0x11   :  { %1072 = vsyncadd [#allocation10], 4294966656  ;;  %vm78_vm0 = vcmask 254976   ;;  %v1082_v1 = vmov 0.0   ;;  %v172_v2 = vld [vmem:[#allocation11 + $0x18] sm:$0xff]  ;;  %v171_v3 = vld [vmem:[#allocation11 + $0x10] sm:$0xff] }
  0x12   :  { %79 = vst.msk [vmem:[#allocation2] sm:$0x3] %vm78_vm0, %v1082_v1  ;;  %192 = vmatpush.msra.mxu1 %v172_v2  ;;  %v170_v4 = vld [vmem:[#allocation11 + $0x8] sm:$0xff]  ;;  %v88_v5 = vld [vmem:[#allocation9] sm:$0xff]  ;;  %vm176_vm1 = vcmask 261120   ;;  %270 = vmatpush.msra.mxu2 %v172_v2  ;;  %v169_v7 = vld [vmem:[#allocation11] sm:$0xff] }
  0x13   :  { %138 = vmatpush.msra.mxu0 %v88_v5  ;;  %v80_v8 = vld [vmem:[#allocation6] sm:$0x3]  ;;  %v81_v9 = vld [vmem:[#allocation6 + $0x2] sm:$0x3]  ;;  %v82_v10 = vld [vmem:[#allocation6 + $0x4] sm:$0x3]  ;;  %340 = vmatpush.msra.mxu3 %v172_v2 }
  0x14   :  { %193 = vmatpush.msra.mxu1 %v171_v3  ;;  %v83_v11 = vld [vmem:[#allocation6 + $0x6] sm:$0x3]  ;;  %101 = vst [vmem:[#allocation1] ss:$4 sm:$0xff] %v80_v8  ;;  %271 = vmatpush.msra.mxu2 %v171_v3  ;;  %v921_v12 = vld [vmem:[%s1241_s4] ss:$0 sm:$0xff] }
  0x15   :  { %103 = vst [vmem:[#allocation1 + $0x1] ss:$4 sm:$0xff] %v81_v9  ;;  %620 = vmatpush.msrb.mxu0 %v172_v2  ;;  %s1083_s20 = smov 64   ;;  %341 = vmatpush.msra.mxu3 %v171_v3  ;;  %vm118_vm2 = vcmask 64512   ;;  %v1155_v17 = vld [vmem:[%s1240_s3] ss:$0 sm:$0xff] }
  0x16   :  { %194 = vmatpush.msra.mxu1 %v170_v4  ;;  %105 = vst [vmem:[#allocation1 + $0x2] ss:$4 sm:$0xff] %v82_v10  ;;  %272 = vmatpush.msra.mxu2 %v170_v4  ;;  %vm160_vm3 = vcmask 779264   ;;  %s1084_s3 = smov 96   ;;  %s878_s27 = sshll.u32 %s1244_s7, 4  ;;  %s879_s27 = int_to_ptr.hbm [resolvable:$true] %s878_s27 }
  0x17   :  { %107 = vst [vmem:[#allocation1 + $0x3] ss:$4 sm:$0xff] %v83_v11  ;;  %222 = vrot.lane.b32.xlu0 %v921_v12, %s1083_s20  ;;  %342 = vmatpush.msra.mxu3 %v170_v4 }
  0x18   :  { %195 = vmatpush.msra.mxu1 %v169_v7  ;;  %273 = vmatpush.msra.mxu2 %v169_v7 }
  0x19   :  { %v174_v6 = vld [vmem:[#allocation2] sm:$0x3]  ;;  %343 = vmatpush.msra.mxu3 %v169_v7  ;;  %621 = vmatpush.msrb.mxu0 %v171_v3 }
  0x1a   :  { %243 = vrot.lane.b32.xlu2 %v174_v6, %s1077_s12  ;;  %891 = vmatmul.msk.f32.vlgmr.msra.gmra.mxu1 %vm176_vm1, %v174_v6 }
  0x1b   :  { %410 = vmatpush.msrb.mxu1 %v172_v2  ;;  %480 = vmatpush.msrb.mxu2 %v172_v2 }
  0x1c   :  { %550 = vmatpush.msrb.mxu3 %v172_v2  ;;  %622 = vmatpush.msrb.mxu0 %v170_v4 }
  0x1d   :  { %411 = vmatpush.msrb.mxu1 %v171_v3  ;;  %481 = vmatpush.msrb.mxu2 %v171_v3 }
  0x1e   :  { %v116_v13 = vld.sshfl [vmem:[#allocation1] sm:$0xff pattern:$0x73625140]  ;;  %551 = vmatpush.msrb.mxu3 %v171_v3  ;;  %623 = vmatpush.msrb.mxu0 %v169_v7 }
  0x1f   :  { %412 = vmatpush.msrb.mxu1 %v170_v4  ;;  %482 = vmatpush.msrb.mxu2 %v170_v4 }
  0x20   :  { %889 = vmatmul.msk.f32.vlgmr.msra.gmra.mxu0 %vm118_vm2, %v116_v13  ;;  %552 = vmatpush.msrb.mxu3 %v170_v4 }
  0x21   :  { %413 = vmatpush.msrb.mxu1 %v169_v7  ;;  %483 = vmatpush.msrb.mxu2 %v169_v7 }
  0x22   :  { %553 = vmatpush.msrb.mxu3 %v169_v7 }
  0x23   :  { %690 = vmatpush.msra.mxu1 %v172_v2 }
  0x25   :  { %691 = vmatpush.msra.mxu1 %v171_v3 }
  0x27   :  { %692 = vmatpush.msra.mxu1 %v170_v4 }
  0x29   :  { %693 = vmatpush.msra.mxu1 %v169_v7 }
  0x74   :  { %v244_v43 = vpop.permute.xlu2 %243 }
  0x89   :  { %v1149_v14 = vpop.permute.xlu0 %222 }
  0x97   :  { %v197_v15 = vpop.f32.mrf.mxu1 }
  0x98   :  { %v225_v16 = vadd.f32 %v1149_v14, %v197_v15 }
  0x9a   :  { %227 = vrot.lane.b32.xlu0 %v225_v16, %s1083_s20 }
  0x9d   :  { %v140_v18 = vpop.f32.mrf.mxu0 }
  0x9e   :  { %v141_v19 = vadd.f32 %v1155_v17, %v140_v18 }
  0xa0   :  { %v148_v20 = vrot.slane %v141_v19, 2  ;;  %v149_v21 = vrot.slane %v141_v19, 4  ;;  %v150_v22 = vrot.slane %v141_v19, 6  ;;  %161 = vst.msk [vmem:[#allocation3] sm:$0x3] %vm160_vm3, %v141_v19 }
  0xa2   :  { %162 = vst.msk [vmem:[#allocation3 + $0x2] sm:$0x3] %vm160_vm3, %v148_v20 }
  0xa3   :  { %163 = vst.msk [vmem:[#allocation3 + $0x4] sm:$0x3] %vm160_vm3, %v149_v21 }
  0xa4   :  { %164 = vst.msk [vmem:[#allocation3 + $0x6] sm:$0x3] %vm160_vm3, %v150_v22 }
  0xa7   :  { %v175_v23 = vld [vmem:[#allocation3] sm:$0x3] }
  0xa8   :  { %v200_v24 = vadd.f32 %v197_v15, %v175_v23 }
  0xa9   :  { %v255_v52 = vld [vmem:[#allocation3 + $0x2] sm:$0x3] }
  0xaa   :  { %v892_v25 = vmul.f32 -1.442695, %v200_v24  ;;  %v325_v18 = vld [vmem:[#allocation3 + $0x4] sm:$0x3] }
  0xac   :  { %925 = vpow2.f32 %v892_v25 }
  0xb2   :  { %v926_v26 = vpop.eup %925 }
  0xb3   :  { %v204_v27 = vadd.f32 1.0, %v926_v26 }
  0xb5   :  { %927 = vrcp.f32 %v204_v27  ;;  %v216_v33 = vand.u32 2147483648, %v204_v27  ;;  %vm210_vm5 = vweird.f32 %v204_v27  ;;  %v214_v34 = vand.u32 2147483647, %v204_v27 }
  0xb7   :  { %v217_v36 = vor.u32 1.1754944e-38, %v216_v33  ;;  %vm215_vm7 = vcmp.eq.f32.partialorder %v214_v34, 8.507059e+37 }
  0xbb   :  { %v928_v28 = vpop.eup %927 }
  0xbc   :  { %v206_v29 = vmul.f32 %v928_v28, %v204_v27  ;;  %vm211_vm4 = vweird.f32 %v928_v28 }
  0xbd   :  { %vm212_vm6 = vmor %vm210_vm5, %vm211_vm4 }
  0xbe   :  { %v207_v30 = vsub.f32 1.0, %v206_v29 }
  0xc0   :  { %v208_v31 = vmul.f32 %v928_v28, %v207_v30 }
  0xc2   :  { %v209_v32 = vadd.f32 %v928_v28, %v208_v31 }
  0xc4   :  { %v213_v35 = vsel %vm212_vm6, %v928_v28, %v209_v32 }
  0xc5   :  { %v218_v37 = vsel %vm215_vm7, %v217_v36, %v213_v35 }
  0xc6   :  { %v237_v44 = vsub.f32 1.0, %v218_v37  ;;  %v246_v46 = vmul.f32 %v244_v43, %v218_v37 }
 0x10c   :  { %v228_v38 = vpop.permute.xlu0 %227 }
 0x10d   :  { %v230_v39 = vmul.f32 %v228_v38, %v218_v37 }
 0x10f   :  { %232 = vrot.lane.b32.xlu1 %v230_v39, %s1083_s20 }
 0x181   :  { %v233_v40 = vpop.permute.xlu1 %232 }
 0x182   :  { %v235_v41 = vadd.f32 %v233_v40, %v175_v23 }
 0x184   :  { %929 = vtanh.f32 %v235_v41 }
 0x18a   :  { %v930_v42 = vpop.eup %929 }
 0x18b   :  { %239 = vrot.lane.b32.xlu1 %v930_v42, %s1084_s3 }
 0x1fd   :  { %v240_v45 = vpop.permute.xlu1 %239 }
 0x1fe   :  { %v242_v47 = vmul.f32 %v240_v45, %v237_v44 }
 0x200   :  { %v247_v48 = vadd.f32 %v246_v46, %v242_v47  ;;  %v395_v46 = vld [vmem:[#allocation3 + $0x6] sm:$0x3] }
 0x202   :  { %249 = vrot.lane.b32.xlu2 %v247_v48, %s1084_s3 }
 0x25c   :  { %v250_v49 = vpop.permute.xlu2 %249 }
 0x25d   :  { %253 = vst.msk [vmem:[#allocation4] sm:$0x3] %vm78_vm0, %v250_v49  ;;  %893 = vmatmul.msk.f32.vlgmr.msra.gmra.mxu2 %vm176_vm1, %v250_v49 }
 0x2e0   :  { %v275_v50 = vpop.f32.mrf.mxu2 }
 0x2e1   :  { %v298_v51 = vadd.f32 %v275_v50, %v1149_v14  ;;  %v278_v53 = vadd.f32 %v275_v50, %v255_v52 }
 0x2e3   :  { %300 = vrot.lane.b32.xlu0 %v298_v51, %s1083_s20  ;;  %v894_v54 = vmul.f32 -1.442695, %v278_v53 }
 0x2e5   :  { %931 = vpow2.f32 %v894_v54 }
 0x2eb   :  { %v932_v55 = vpop.eup %931 }
 0x2ec   :  { %v282_v56 = vadd.f32 1.0, %v932_v55 }
 0x2ee   :  { %933 = vrcp.f32 %v282_v56  ;;  %v294_v62 = vand.u32 2147483648, %v282_v56  ;;  %vm288_vm9 = vweird.f32 %v282_v56  ;;  %v292_v63 = vand.u32 2147483647, %v282_v56 }
 0x2f0   :  { %v295_v1 = vor.u32 1.1754944e-38, %v294_v62  ;;  %vm293_vm11 = vcmp.eq.f32.partialorder %v292_v63, 8.507059e+37 }
 0x2f4   :  { %v934_v57 = vpop.eup %933 }
 0x2f5   :  { %v284_v58 = vmul.f32 %v934_v57, %v282_v56  ;;  %vm289_vm8 = vweird.f32 %v934_v57 }
 0x2f6   :  { %vm290_vm10 = vmor %vm288_vm9, %vm289_vm8 }
 0x2f7   :  { %v285_v59 = vsub.f32 1.0, %v284_v58 }
 0x2f9   :  { %v286_v60 = vmul.f32 %v934_v57, %v285_v59 }
 0x2fb   :  { %v287_v61 = vadd.f32 %v934_v57, %v286_v60 }
 0x2fd   :  { %v291_v0 = vsel %vm290_vm10, %v934_v57, %v287_v61 }
 0x2fe   :  { %v296_v3 = vsel %vm293_vm11, %v295_v1, %v291_v0 }
 0x2ff   :  { %v310_v8 = vsub.f32 1.0, %v296_v3  ;;  %v316_v10 = vmul.f32 %v296_v3, %v247_v48 }
 0x355   :  { %v301_v2 = vpop.permute.xlu0 %300 }
 0x356   :  { %v303_v4 = vmul.f32 %v301_v2, %v296_v3  ;;  %v84_v2 = vld [vmem:[#allocation6 + $0x8] sm:$0x3]  ;;  %v85_v3 = vld [vmem:[#allocation6 + $0xa] sm:$0x3] }
 0x357   :  { %109 = vst [vmem:[#allocation1 + $0x20] ss:$4 sm:$0xff] %v84_v2 }
 0x358   :  { %305 = vrot.lane.b32.xlu1 %v303_v4, %s1083_s20  ;;  %v86_v4 = vld [vmem:[#allocation6 + $0xc] sm:$0x3]  ;;  %111 = vst [vmem:[#allocation1 + $0x21] ss:$4 sm:$0xff] %v85_v3 }
 0x359   :  { %113 = vst [vmem:[#allocation1 + $0x22] ss:$4 sm:$0xff] %v86_v4 }
 0x3ca   :  { %v306_v5 = vpop.permute.xlu1 %305 }
 0x3cb   :  { %v308_v6 = vadd.f32 %v306_v5, %v255_v52  ;;  %v87_v5 = vld [vmem:[#allocation6 + $0xe] sm:$0x3] }
 0x3cc   :  { %115 = vst [vmem:[#allocation1 + $0x23] ss:$4 sm:$0xff] %v87_v5 }
 0x3cd   :  { %935 = vtanh.f32 %v308_v6 }
 0x3d3   :  { %v936_v7 = vpop.eup %935  ;;  %v117_v6 = vld.sshfl [vmem:[#allocation1 + $0x20] sm:$0xff pattern:$0x73625140] }
 0x3d4   :  { %312 = vrot.lane.b32.xlu2 %v936_v7, %s1084_s3  ;;  %890 = vmatmul.msk.f32.gmra.mxu0 %vm118_vm2, %v117_v6 }
 0x42e   :  { %v313_v9 = vpop.permute.xlu2 %312 }
 0x42f   :  { %v315_v11 = vmul.f32 %v313_v9, %v310_v8 }
 0x431   :  { %v317_v12 = vadd.f32 %v316_v10, %v315_v11 }
 0x433   :  { %319 = vrot.lane.b32.xlu0 %v317_v12, %s1084_s3 }
 0x4a5   :  { %v320_v13 = vpop.permute.xlu0 %319 }
 0x4a6   :  { %323 = vst.msk [vmem:[#allocation4 + $0x2] sm:$0x3] %vm78_vm0, %v320_v13  ;;  %895 = vmatmul.msk.f32.vlgmr.msra.gmra.mxu3 %vm176_vm1, %v320_v13  ;;  %v143_v13 = vpop.f32.mrf.mxu0 }
 0x529   :  { %v345_v15 = vpop.f32.mrf.mxu3 }
 0x52a   :  { %v368_v16 = vadd.f32 %v345_v15, %v1149_v14  ;;  %v348_v19 = vadd.f32 %v345_v15, %v325_v18  ;;  %v144_v15 = vadd.f32 %v1155_v17, %v143_v13 }
 0x52c   :  { %370 = vrot.lane.b32.xlu1 %v368_v16, %s1083_s20  ;;  %v896_v20 = vmul.f32 -1.442695, %v348_v19  ;;  %v151_v16 = vrot.slane %v144_v15, 2  ;;  %v153_v19 = vrot.slane %v144_v15, 6  ;;  %165 = vst.msk [vmem:[#allocation3 + $0x8] sm:$0x3] %vm160_vm3, %v144_v15 }
 0x52e   :  { %937 = vpow2.f32 %v896_v20  ;;  %166 = vst.msk [vmem:[#allocation3 + $0xa] sm:$0x3] %vm160_vm3, %v151_v16 }
 0x52f   :  { %168 = vst.msk [vmem:[#allocation3 + $0xe] sm:$0x3] %vm160_vm3, %v153_v19 }
 0x534   :  { %v938_v21 = vpop.eup %937 }
 0x535   :  { %v352_v22 = vadd.f32 1.0, %v938_v21 }
 0x537   :  { %939 = vrcp.f32 %v352_v22  ;;  %v364_v28 = vand.u32 2147483648, %v352_v22  ;;  %vm358_vm13 = vweird.f32 %v352_v22  ;;  %v362_v29 = vand.u32 2147483647, %v352_v22 }
 0x539   :  { %v365_v31 = vor.u32 1.1754944e-38, %v364_v28  ;;  %vm363_vm15 = vcmp.eq.f32.partialorder %v362_v29, 8.507059e+37 }
 0x53d   :  { %v940_v23 = vpop.eup %939 }
 0x53e   :  { %v354_v24 = vmul.f32 %v940_v23, %v352_v22  ;;  %vm359_vm12 = vweird.f32 %v940_v23  ;;  %v465_v22 = vld [vmem:[#allocation3 + $0x8] sm:$0x3] }
 0x53f   :  { %vm360_vm14 = vmor %vm358_vm13, %vm359_vm12 }
 0x540   :  { %v355_v25 = vsub.f32 1.0, %v354_v24 }
 0x542   :  { %v356_v26 = vmul.f32 %v940_v23, %v355_v25 }
 0x544   :  { %v357_v27 = vadd.f32 %v940_v23, %v356_v26 }
 0x546   :  { %v361_v30 = vsel %vm360_vm14, %v940_v23, %v357_v27 }
 0x547   :  { %v366_v33 = vsel %vm363_vm15, %v365_v31, %v361_v30 }
 0x548   :  { %v380_v38 = vsub.f32 1.0, %v366_v33  ;;  %v386_v40 = vmul.f32 %v366_v33, %v317_v12 }
 0x59e   :  { %v371_v32 = vpop.permute.xlu1 %370 }
 0x59f   :  { %v373_v34 = vmul.f32 %v371_v32, %v366_v33 }
 0x5a1   :  { %375 = vrot.lane.b32.xlu2 %v373_v34, %s1083_s20 }
 0x5fb   :  { %v376_v35 = vpop.permute.xlu2 %375 }
 0x5fc   :  { %v378_v36 = vadd.f32 %v376_v35, %v325_v18  ;;  %v152_v18 = vrot.slane %v144_v15, 4 }
 0x5fe   :  { %941 = vtanh.f32 %v378_v36  ;;  %167 = vst.msk [vmem:[#allocation3 + $0xc] sm:$0x3] %vm160_vm3, %v152_v18 }
 0x604   :  { %v942_v37 = vpop.eup %941 }
 0x605   :  { %382 = vrot.lane.b32.xlu0 %v942_v37, %s1084_s3  ;;  %v605_v13 = vld [vmem:[#allocation3 + $0xc] sm:$0x3] }
 0x677   :  { %v383_v39 = vpop.permute.xlu0 %382 }
 0x678   :  { %v385_v41 = vmul.f32 %v383_v39, %v380_v38 }
 0x67a   :  { %v387_v42 = vadd.f32 %v386_v40, %v385_v41 }
 0x67c   :  { %389 = vrot.lane.b32.xlu1 %v387_v42, %s1084_s3 }
 0x6ee   :  { %v390_v43 = vpop.permute.xlu1 %389 }
 0x6ef   :  { %393 = vst.msk [vmem:[#allocation4 + $0x4] sm:$0x3] %vm78_vm0, %v390_v43  ;;  %897 = vmatmul.msk.f32.vlgmr.msrb.gmra.mxu1 %vm176_vm1, %v390_v43 }
 0x76c   :  { %v415_v44 = vpop.f32.mrf.mxu1 }
 0x76d   :  { %v438_v45 = vadd.f32 %v415_v44, %v1149_v14  ;;  %v418_v47 = vadd.f32 %v415_v44, %v395_v46 }
 0x76f   :  { %440 = vrot.lane.b32.xlu2 %v438_v45, %s1083_s20  ;;  %v898_v48 = vmul.f32 -1.442695, %v418_v47 }
 0x771   :  { %943 = vpow2.f32 %v898_v48 }
 0x777   :  { %v944_v49 = vpop.eup %943 }
 0x778   :  { %v422_v50 = vadd.f32 1.0, %v944_v49  ;;  %v535_v49 = vld [vmem:[#allocation3 + $0xa] sm:$0x3] }
 0x77a   :  { %945 = vrcp.f32 %v422_v50  ;;  %v434_v56 = vand.u32 2147483648, %v422_v50  ;;  %vm428_vm5 = vweird.f32 %v422_v50  ;;  %v432_v57 = vand.u32 2147483647, %v422_v50 }
 0x77c   :  { %v435_v59 = vor.u32 1.1754944e-38, %v434_v56  ;;  %vm433_vm7 = vcmp.eq.f32.partialorder %v432_v57, 8.507059e+37 }
 0x780   :  { %v946_v51 = vpop.eup %945 }
 0x781   :  { %v424_v52 = vmul.f32 %v946_v51, %v422_v50  ;;  %vm429_vm4 = vweird.f32 %v946_v51 }
 0x782   :  { %vm430_vm6 = vmor %vm428_vm5, %vm429_vm4 }
 0x783   :  { %v425_v53 = vsub.f32 1.0, %v424_v52 }
 0x785   :  { %v426_v54 = vmul.f32 %v946_v51, %v425_v53 }
 0x787   :  { %v427_v55 = vadd.f32 %v946_v51, %v426_v54 }
 0x789   :  { %v431_v58 = vsel %vm430_vm6, %v946_v51, %v427_v55 }
 0x78a   :  { %v436_v61 = vsel %vm433_vm7, %v435_v59, %v431_v58 }
 0x78b   :  { %v450_v7 = vsub.f32 1.0, %v436_v61  ;;  %v456_v9 = vmul.f32 %v436_v61, %v387_v42 }
 0x7c9   :  { %v441_v60 = vpop.permute.xlu2 %440 }
 0x7ca   :  { %v443_v62 = vmul.f32 %v441_v60, %v436_v61 }
 0x7cc   :  { %445 = vrot.lane.b32.xlu0 %v443_v62, %s1083_s20 }
 0x83e   :  { %v446_v63 = vpop.permute.xlu0 %445 }
 0x83f   :  { %v448_v0 = vadd.f32 %v446_v63, %v395_v46 }
 0x841   :  { %947 = vtanh.f32 %v448_v0 }
 0x847   :  { %v948_v1 = vpop.eup %947 }
 0x848   :  { %452 = vrot.lane.b32.xlu1 %v948_v1, %s1084_s3 }
 0x8ba   :  { %v453_v8 = vpop.permute.xlu1 %452 }
 0x8bb   :  { %v455_v10 = vmul.f32 %v453_v8, %v450_v7 }
 0x8bd   :  { %v457_v11 = vadd.f32 %v456_v9, %v455_v10 }
 0x8bf   :  { %459 = vrot.lane.b32.xlu2 %v457_v11, %s1084_s3 }
 0x919   :  { %v460_v12 = vpop.permute.xlu2 %459 }
 0x91a   :  { %463 = vst.msk [vmem:[#allocation4 + $0x6] sm:$0x3] %vm78_vm0, %v460_v12  ;;  %899 = vmatmul.msk.f32.vlgmr.msrb.gmra.mxu2 %vm176_vm1, %v460_v12 }
 0x99d   :  { %v485_v20 = vpop.f32.mrf.mxu2 }
 0x99e   :  { %v508_v21 = vadd.f32 %v485_v20, %v1149_v14  ;;  %v488_v23 = vadd.f32 %v485_v20, %v465_v22 }
 0x9a0   :  { %510 = vrot.lane.b32.xlu0 %v508_v21, %s1083_s20  ;;  %v900_v24 = vmul.f32 -1.442695, %v488_v23 }
 0x9a2   :  { %949 = vpow2.f32 %v900_v24 }
 0x9a8   :  { %v950_v17 = vpop.eup %949 }
 0x9a9   :  { %v492_v25 = vadd.f32 1.0, %v950_v17 }
 0x9ab   :  { %951 = vrcp.f32 %v492_v25  ;;  %v504_v31 = vand.u32 2147483648, %v492_v25  ;;  %vm498_vm3 = vweird.f32 %v492_v25  ;;  %v502_v32 = vand.u32 2147483647, %v492_v25 }
 0x9ad   :  { %v505_v34 = vor.u32 1.1754944e-38, %v504_v31  ;;  %vm503_vm9 = vcmp.eq.f32.partialorder %v502_v32, 8.507059e+37 }
 0x9b1   :  { %v952_v26 = vpop.eup %951 }
 0x9b2   :  { %v494_v27 = vmul.f32 %v952_v26, %v492_v25  ;;  %vm499_vm2 = vweird.f32 %v952_v26 }
 0x9b3   :  { %vm500_vm8 = vmor %vm498_vm3, %vm499_vm2  ;;  %vm822_vm3 = vcmask 1041409  }
 0x9b4   :  { %v495_v28 = vsub.f32 1.0, %v494_v27 }
 0x9b6   :  { %v496_v29 = vmul.f32 %v952_v26, %v495_v28 }
 0x9b8   :  { %v497_v30 = vadd.f32 %v952_v26, %v496_v29 }
 0x9ba   :  { %v501_v33 = vsel %vm500_vm8, %v952_v26, %v497_v30  ;;  %vm824_vm8 = vcmask 1042434  }
 0x9bb   :  { %v506_v36 = vsel %vm503_vm9, %v505_v34, %v501_v33  ;;  %vm828_vm9 = vcmask 1044484  }
 0x9bc   :  { %v520_v41 = vsub.f32 1.0, %v506_v36  ;;  %v526_v43 = vmul.f32 %v506_v36, %v457_v11 }
 0xa12   :  { %v511_v35 = vpop.permute.xlu0 %510 }
 0xa13   :  { %v513_v37 = vmul.f32 %v511_v35, %v506_v36 }
 0xa15   :  { %515 = vrot.lane.b32.xlu1 %v513_v37, %s1083_s20 }
 0xa87   :  { %v516_v38 = vpop.permute.xlu1 %515 }
 0xa88   :  { %v518_v39 = vadd.f32 %v516_v38, %v465_v22 }
 0xa8a   :  { %953 = vtanh.f32 %v518_v39 }
 0xa90   :  { %v954_v40 = vpop.eup %953 }
 0xa91   :  { %522 = vrot.lane.b32.xlu2 %v954_v40, %s1084_s3 }
 0xaeb   :  { %v523_v42 = vpop.permute.xlu2 %522 }
 0xaec   :  { %v525_v44 = vmul.f32 %v523_v42, %v520_v41  ;;  %v675_v42 = vld [vmem:[#allocation3 + $0xe] sm:$0x3] }
 0xaee   :  { %v527_v45 = vadd.f32 %v526_v43, %v525_v44 }
 0xaf0   :  { %529 = vrot.lane.b32.xlu0 %v527_v45, %s1084_s3 }
 0xb62   :  { %v530_v46 = vpop.permute.xlu0 %529 }
 0xb63   :  { %533 = vst.msk [vmem:[#allocation4 + $0x8] sm:$0x3] %vm78_vm0, %v530_v46  ;;  %901 = vmatmul.msk.f32.vlgmr.msrb.gmra.mxu3 %vm176_vm1, %v530_v46 }
 0xbe6   :  { %v555_v47 = vpop.f32.mrf.mxu3 }
 0xbe7   :  { %v578_v48 = vadd.f32 %v555_v47, %v1149_v14  ;;  %v558_v50 = vadd.f32 %v555_v47, %v535_v49 }
 0xbe9   :  { %580 = vrot.lane.b32.xlu1 %v578_v48, %s1083_s20  ;;  %v902_v51 = vmul.f32 -1.442695, %v558_v50 }
 0xbeb   :  { %955 = vpow2.f32 %v902_v51 }
 0xbf1   :  { %v956_v52 = vpop.eup %955 }
 0xbf2   :  { %v562_v53 = vadd.f32 1.0, %v956_v52 }
 0xbf4   :  { %957 = vrcp.f32 %v562_v53  ;;  %v574_v59 = vand.u32 2147483648, %v562_v53  ;;  %vm568_vm11 = vweird.f32 %v562_v53  ;;  %v572_v60 = vand.u32 2147483647, %v562_v53 }
 0xbf6   :  { %v575_v62 = vor.u32 1.1754944e-38, %v574_v59  ;;  %vm573_vm13 = vcmp.eq.f32.partialorder %v572_v60, 8.507059e+37  ;;  %v746_v59 = vld [vmem:[#allocation4] sm:$0x3] }
 0xbfa   :  { %v958_v54 = vpop.eup %957 }
 0xbfb   :  { %v564_v55 = vmul.f32 %v958_v54, %v562_v53  ;;  %vm569_vm10 = vweird.f32 %v958_v54 }
 0xbfc   :  { %vm570_vm12 = vmor %vm568_vm11, %vm569_vm10  ;;  %vm830_vm10 = vcmask 1045509   ;;  %vm832_vm11 = vcmask 1046534  }
 0xbfd   :  { %v565_v56 = vsub.f32 1.0, %v564_v55 }
 0xbff   :  { %v566_v57 = vmul.f32 %v958_v54, %v565_v56 }
 0xc01   :  { %v567_v58 = vadd.f32 %v958_v54, %v566_v57 }
 0xc03   :  { %v571_v61 = vsel %vm570_vm12, %v958_v54, %v567_v58  ;;  %v923_v58 = vld [vmem:[%s1242_s5] ss:$0 sm:$0xff]  ;;  %vm834_vm12 = vcmask 1047559   ;;  %s1086_s5 = smov [#allocation12]  }
 0xc04   :  { %v576_v0 = vsel %vm573_vm13, %v575_v62, %v571_v61  ;;  %v757_v60 = vmul.f32 %v923_v58, %v746_v59  ;;  %v749_v62 = vld [vmem:[#allocation4 + $0x6] sm:$0x3]  ;;  %s876_s24 = sshll.u32 %s1086_s5, 4  ;;  %vm869_vm13 = vcmask 58368   ;;  %s877_s24 = int_to_ptr.vmem [resolvable:$true] %s876_s24 }
 0xc05   :  { %v590_v5 = vsub.f32 1.0, %v576_v0  ;;  %v596_v7 = vmul.f32 %v576_v0, %v527_v45 }
 0xc06   :  { %v765_v61 = vsel %vm78_vm0, %v757_v60, 0.0 }
 0xc5b   :  { %v581_v63 = vpop.permute.xlu1 %580 }
 0xc5c   :  { %v583_v1 = vmul.f32 %v581_v63, %v576_v0  ;;  %v760_v63 = vmul.f32 %v923_v58, %v749_v62 }
 0xc5e   :  { %585 = vrot.lane.b32.xlu2 %v583_v1, %s1083_s20  ;;  %v774_v0 = vsel %vm78_vm0, %v760_v63, 0.0 }
 0xcb8   :  { %v586_v2 = vpop.permute.xlu2 %585 }
 0xcb9   :  { %v588_v3 = vadd.f32 %v586_v2, %v535_v49 }
 0xcbb   :  { %959 = vtanh.f32 %v588_v3 }
 0xcc1   :  { %v960_v4 = vpop.eup %959 }
 0xcc2   :  { %592 = vrot.lane.b32.xlu0 %v960_v4, %s1084_s3 }
 0xd34   :  { %v593_v6 = vpop.permute.xlu0 %592 }
 0xd35   :  { %v595_v8 = vmul.f32 %v593_v6, %v590_v5 }
 0xd37   :  { %v597_v9 = vadd.f32 %v596_v7, %v595_v8  ;;  %v1085_v7 = vmov 0   ;;  %v747_v8 = vld [vmem:[#allocation4 + $0x2] sm:$0x3] }
 0xd38   :  { %919 = vset.pattern.permute.xlu2 %v1085_v7  ;;  %920 = vset.pattern.permute.xlu0 %v1085_v7 }
 0xd39   :  { %599 = vrot.lane.b32.xlu1 %v597_v9, %s1084_s3 }
 0xdab   :  { %v600_v10 = vpop.permute.xlu1 %599 }
 0xdac   :  { %603 = vst.msk [vmem:[#allocation4 + $0xa] sm:$0x3] %vm78_vm0, %v600_v10  ;;  %903 = vmatmul.msk.f32.vlgmr.msrb.gmra.mxu0 %vm176_vm1, %v600_v10 }
 0xdb3   :  { %v751_v1 = vld [vmem:[#allocation4 + $0xa] sm:$0x3] }
 0xdb4   :  { %v762_v2 = vmul.f32 %v923_v58, %v751_v1 }
 0xdb6   :  { %v780_v3 = vsel %vm78_vm0, %v762_v2, 0.0 }
 0xe29   :  { %v625_v11 = vpop.f32.mrf.mxu0 }
 0xe2a   :  { %v648_v12 = vadd.f32 %v625_v11, %v1149_v14  ;;  %v628_v15 = vadd.f32 %v625_v11, %v605_v13  ;;  %v924_v11 = vld [vmem:[#allocation5] ss:$0 sm:$0xff] }
 0xe2c   :  { %650 = vrot.lane.b32.xlu2 %v648_v12, %s1083_s20  ;;  %v904_v16 = vmul.f32 -1.442695, %v628_v15 }
 0xe2e   :  { %961 = vpow2.f32 %v904_v16 }
 0xe34   :  { %v962_v18 = vpop.eup %961 }
 0xe35   :  { %v632_v19 = vadd.f32 1.0, %v962_v18 }
 0xe37   :  { %963 = vrcp.f32 %v632_v19  ;;  %v644_v17 = vand.u32 2147483648, %v632_v19  ;;  %vm638_vm15 = vweird.f32 %v632_v19  ;;  %v642_v25 = vand.u32 2147483647, %v632_v19 }
 0xe39   :  { %v645_v27 = vor.u32 1.1754944e-38, %v644_v17  ;;  %vm643_vm5 = vcmp.eq.f32.partialorder %v642_v25, 8.507059e+37 }
 0xe3d   :  { %v964_v20 = vpop.eup %963 }
 0xe3e   :  { %v634_v21 = vmul.f32 %v964_v20, %v632_v19  ;;  %vm639_vm14 = vweird.f32 %v964_v20  ;;  %v748_v19 = vld [vmem:[#allocation4 + $0x4] sm:$0x3] }
 0xe3f   :  { %vm640_vm4 = vmor %vm638_vm15, %vm639_vm14 }
 0xe40   :  { %v635_v22 = vsub.f32 1.0, %v634_v21 }
 0xe42   :  { %v636_v23 = vmul.f32 %v964_v20, %v635_v22  ;;  %v750_v22 = vld [vmem:[#allocation4 + $0x8] sm:$0x3] }
 0xe44   :  { %v637_v24 = vadd.f32 %v964_v20, %v636_v23  ;;  %v761_v23 = vmul.f32 %v923_v58, %v750_v22 }
 0xe46   :  { %v641_v26 = vsel %vm640_vm4, %v964_v20, %v637_v24  ;;  %v759_v20 = vmul.f32 %v923_v58, %v748_v19  ;;  %v777_v24 = vsel %vm78_vm0, %v761_v23, 0.0 }
 0xe47   :  { %v646_v29 = vsel %vm643_vm5, %v645_v27, %v641_v26 }
 0xe48   :  { %v660_v34 = vsub.f32 1.0, %v646_v29  ;;  %v666_v36 = vmul.f32 %v646_v29, %v597_v9  ;;  %v758_v9 = vmul.f32 %v923_v58, %v747_v8  ;;  %v771_v21 = vsel %vm78_vm0, %v759_v20, 0.0 }
 0xe4a   :  { %v768_v10 = vsel %vm78_vm0, %v758_v9, 0.0 }
 0xe86   :  { %v651_v28 = vpop.permute.xlu2 %650 }
 0xe87   :  { %v653_v30 = vmul.f32 %v651_v28, %v646_v29 }
 0xe89   :  { %655 = vrot.lane.b32.xlu0 %v653_v30, %s1083_s20 }
 0xefb   :  { %v656_v31 = vpop.permute.xlu0 %655 }
 0xefc   :  { %v658_v32 = vadd.f32 %v656_v31, %v605_v13 }
 0xefe   :  { %965 = vtanh.f32 %v658_v32 }
 0xf04   :  { %v966_v33 = vpop.eup %965 }
 0xf05   :  { %662 = vrot.lane.b32.xlu1 %v966_v33, %s1084_s3 }
 0xf77   :  { %v663_v35 = vpop.permute.xlu1 %662 }
 0xf78   :  { %v665_v37 = vmul.f32 %v663_v35, %v660_v34  ;;  %v812_v35 = vlaneseq }
 0xf7a   :  { %v667_v38 = vadd.f32 %v666_v36, %v665_v37 }
 0xf7c   :  { %669 = vrot.lane.b32.xlu2 %v667_v38, %s1084_s3 }
 0xfd6   :  { %v670_v39 = vpop.permute.xlu2 %669 }
 0xfd7   :  { %673 = vst.msk [vmem:[#allocation4 + $0xc] sm:$0x3] %vm78_vm0, %v670_v39  ;;  %905 = vmatmul.msk.f32.vlgmr.msra.gmra.mxu1 %vm176_vm1, %v670_v39 }
 0xfde   :  { %v752_v17 = vld [vmem:[#allocation4 + $0xc] sm:$0x3] }
 0xfdf   :  { %v763_v25 = vmul.f32 %v923_v58, %v752_v17 }
 0xfe1   :  { %v783_v26 = vsel %vm78_vm0, %v763_v25, 0.0 }
0x1054   :  { %v695_v40 = vpop.f32.mrf.mxu1 }
0x1055   :  { %v718_v41 = vadd.f32 %v695_v40, %v1149_v14  ;;  %v698_v43 = vadd.f32 %v695_v40, %v675_v42 }
0x1057   :  { %720 = vrot.lane.b32.xlu0 %v718_v41, %s1083_s20  ;;  %v906_v44 = vmul.f32 -1.442695, %v698_v43 }
0x1059   :  { %967 = vpow2.f32 %v906_v44 }
0x105f   :  { %v968_v45 = vpop.eup %967 }
0x1060   :  { %v702_v46 = vadd.f32 1.0, %v968_v45 }
0x1062   :  { %969 = vrcp.f32 %v702_v46  ;;  %v714_v52 = vand.u32 2147483648, %v702_v46  ;;  %vm708_vm1 = vweird.f32 %v702_v46  ;;  %v712_v53 = vand.u32 2147483647, %v702_v46 }
0x1064   :  { %v715_v54 = vor.u32 1.1754944e-38, %v714_v52  ;;  %vm713_vm2 = vcmp.eq.f32.partialorder %v712_v53, 8.507059e+37 }
0x1068   :  { %v970_v47 = vpop.eup %969 }
0x1069   :  { %v704_v48 = vmul.f32 %v970_v47, %v702_v46  ;;  %vm709_vm6 = vweird.f32 %v970_v47 }
0x106a   :  { %vm710_vm7 = vmor %vm708_vm1, %vm709_vm6 }
0x106b   :  { %v705_v49 = vsub.f32 1.0, %v704_v48 }
0x106d   :  { %v706_v50 = vmul.f32 %v970_v47, %v705_v49 }
0x106f   :  { %v707_v51 = vadd.f32 %v970_v47, %v706_v50 }
0x1071   :  { %v711_v14 = vsel %vm710_vm7, %v970_v47, %v707_v51 }
0x1072   :  { %v716_v56 = vsel %vm713_vm2, %v715_v54, %v711_v14 }
0x1073   :  { %v730_v12 = vsub.f32 1.0, %v716_v56  ;;  %v736_v15 = vmul.f32 %v716_v56, %v667_v38  ;;  %v813_v38 = vand.u32 127, %v812_v35 }
0x10c9   :  { %v721_v55 = vpop.permute.xlu0 %720 }
0x10ca   :  { %v723_v57 = vmul.f32 %v721_v55, %v716_v56 }
0x10cc   :  { %725 = vrot.lane.b32.xlu1 %v723_v57, %s1083_s20 }
0x10f6   :  { %766 = vadd.xlane.f32.xlu1 %v765_v61 }
0x10fe   :  { %775 = vadd.xlane.f32.xlu1 %v774_v0 }
0x1106   :  { %781 = vadd.xlane.f32.xlu1 %v780_v3 }
0x113e   :  { %v726_v4 = vpop.permute.xlu1 %725 }
0x113f   :  { %v728_v5 = vadd.f32 %v726_v4, %v675_v42 }
0x1141   :  { %971 = vtanh.f32 %v728_v5 }
0x1147   :  { %v972_v6 = vpop.eup %971 }
0x1148   :  { %732 = vrot.lane.b32.xlu2 %v972_v6, %s1084_s3 }
0x1169   :  { %v767_v31 = vpop.xlane.xlu1 %766 }
0x1171   :  { %769 = vadd.xlane.f32.xlu2 %v768_v10  ;;  %v776_v34 = vpop.xlane.xlu1 %775 }
0x1179   :  { %v782_v44 = vpop.xlane.xlu1 %781 }
0x1189   :  { %793 = vperm.xlu2 %919, %v924_v11  }
0x11a2   :  { %v733_v13 = vpop.permute.xlu2 %732 }
0x11a3   :  { %v735_v16 = vmul.f32 %v733_v13, %v730_v12 }
0x11a5   :  { %v737_v18 = vadd.f32 %v736_v15, %v735_v16 }
0x11a7   :  { %739 = vrot.lane.b32.xlu0 %v737_v18, %s1084_s3 }
0x11d1   :  { %772 = vadd.xlane.f32.xlu0 %v771_v21 }
0x11d9   :  { %778 = vadd.xlane.f32.xlu0 %v777_v24 }
0x11e1   :  { %784 = vadd.xlane.f32.xlu0 %v783_v26 }
0x11e4   :  { %v770_v33 = vpop.xlane.xlu2 %769 }
0x11ec   :  { %v794_v37 = vpop.permute.xlu2 %793 }
0x11ed   :  { %v796_v39 = vadd.f32 %v794_v37, %v767_v31  ;;  %v797_v40 = vadd.f32 %v794_v37, %v770_v33  ;;  %v799_v47 = vadd.f32 %v794_v37, %v776_v34  ;;  %v801_v14 = vadd.f32 %v794_v37, %v782_v44 }
0x11ef   :  { %v814_v42 = vperm.slane %v796_v39, %v813_v38  ;;  %v815_v43 = vperm.slane %v797_v40, %v813_v38  ;;  %v817_v53 = vperm.slane %v799_v47, %v813_v38  ;;  %v819_v59 = vperm.slane %v801_v14, %v813_v38 }
0x11f1   :  { %v823_v49 = vsel %vm822_vm3, %v815_v43, %v814_v42 }
0x1219   :  { %v740_v27 = vpop.permute.xlu0 %739 }
0x121a   :  { %743 = vst.msk [vmem:[#allocation4 + $0xe] sm:$0x3] %vm78_vm0, %v740_v27 }
0x121b   :  { %744 = vst.msk [vmem:[#allocation2] sm:$0x3] %vm78_vm0, %v740_v27 }
0x1221   :  { %v753_v28 = vld [vmem:[#allocation4 + $0xe] sm:$0x3] }
0x1222   :  { %v764_v29 = vmul.f32 %v923_v58, %v753_v28 }
0x1224   :  { %v786_v30 = vsel %vm78_vm0, %v764_v29, 0.0  ;;  %vm826_vm0 = vcmask 1043459  }
0x1225   :  { %787 = vadd.xlane.f32.xlu1 %v786_v30 }
0x1244   :  { %v773_v32 = vpop.xlane.xlu0 %772 }
0x1245   :  { %v798_v41 = vadd.f32 %v794_v37, %v773_v32 }
0x1247   :  { %v816_v45 = vperm.slane %v798_v41, %v813_v38 }
0x1249   :  { %v825_v50 = vsel %vm824_vm8, %v816_v45, %v823_v49 }
0x124a   :  { %v827_v54 = vsel %vm826_vm0, %v817_v53, %v825_v50 }
0x124c   :  { %v779_v36 = vpop.xlane.xlu0 %778 }
0x124d   :  { %v800_v46 = vadd.f32 %v794_v37, %v779_v36 }
0x124f   :  { %v818_v51 = vperm.slane %v800_v46, %v813_v38 }
0x1251   :  { %v829_v55 = vsel %vm828_vm9, %v818_v51, %v827_v54 }
0x1252   :  { %v831_v61 = vsel %vm830_vm10, %v819_v59, %v829_v55 }
0x1254   :  { %v785_v48 = vpop.xlane.xlu0 %784 }
0x1255   :  { %v802_v52 = vadd.f32 %v794_v37, %v785_v48 }
0x1257   :  { %v820_v56 = vperm.slane %v802_v52, %v813_v38 }
0x1259   :  { %v833_v62 = vsel %vm832_vm11, %v820_v56, %v831_v61 }
0x1298   :  { %v788_v57 = vpop.xlane.xlu1 %787 }
0x1299   :  { %v803_v58 = vadd.f32 %v794_v37, %v788_v57 }
0x129b   :  { %v821_v60 = vperm.slane %v803_v58, %v813_v38 }
0x129d   :  { %v835_v63 = vsel %vm834_vm12, %v821_v60, %v833_v62 }
0x129e   :  { %837 = vxpose.xlu2.b32.start.end [1/1] (short) (narrow) %v835_v63, 8 }
0x1337   :  { %v853_v0 = vpop.trf.xlu2 }
0x1338   :  { %870 = vst.msk [vmem:[#allocation12] sm:$0x3] %vm869_vm13, %v853_v0 }
0x1339   :  { %881 = dma.vmem_to_hbm [thread:$0]  %s877_s24, 32, %s879_s27, [#allocation8]  }
0x133a   :  { %1073 = dma.done.wait [#allocation8], 32  }
0x133b   :  { %1074 = vsyncadd [#allocation8], 4294967264 }
0x133c   :  { %886 = vsyncpa [#allocation7], 1 }
0x133d   :  { %887 = vsyncpa [#allocation10], 1 }
0x133e   :  { %888 = vsyncpa [#allocation8], 1 }

</bundles_post_ra>
